<compile_context>
chip_gen: v7x
topology: tpu7x:2x2x1
jax: 0.10.0
libtpu: 0.0.40
codegen_flags: <defaults>
</compile_context>

<pallas_src>
import functools

import jax
import jax.numpy as jnp
from jax import lax
from jax.experimental import pallas as pl
from jax.experimental.pallas import tpu as pltpu


def _round_up(x, m):
    return (x + m - 1) // m * m


# ----------------------------------------------------------------------------
# Fused Block35 kernel
# ----------------------------------------------------------------------------

def _im2col_3x3(pad_ref, ml_b, mr_b, *, HW, W, R0):
    """(HW, 9*64) bf16 im2col slab from a zero-padded row-flattened scratch.

    pad_ref : f32 VMEM scratch (PAD_ROWS, 64); real pixels at rows
              [R0, R0 + HW), vertical pad rows are zero.
    ml_b/mr_b : f32 (HW, 64) masks (0 where w == 0 / w == W-1) killing the
              horizontal wrap-around of the row-flattened layout.
    Tap order matches the (9, 64, Cout) weight reshape: tap = (dh+1)*3+(dw+1).
    """
    taps = []
    for dh in (-1, 0, 1):
        for dw in (-1, 0, 1):
            v = pad_ref[pl.ds(R0 + dh * W + dw, HW), :]
            if dw == -1:
                v = v * ml_b
            elif dw == 1:
                v = v * mr_b
            taps.append(v.astype(jnp.bfloat16))
    return jnp.concatenate(taps, axis=-1)                 # (HW, 576) bf16


def _block35_kernel(x_ref, ml_ref, mr_ref,
                    w1_ref, c1_ref,
                    w3a_ref, c3a_ref,
                    w3b_ref, c3b_ref,
                    wf_ref, cf_ref,
                    o_ref,
                    pad_ref,
                    *, HW, W, R0, PAD_ROWS):
    xv = x_ref[...].astype(jnp.float32)                   # (HW, 320) residual
    x_bf = x_ref[...].astype(jnp.bfloat16)                # MXU operand

    # Hoisted lane-broadcast of the horizontal-edge masks (reused by both 3x3
    # convolutions — both run on the same 64-wide padded scratch).
    ml_b = jnp.broadcast_to(ml_ref[...], (HW, 64))
    mr_b = jnp.broadcast_to(mr_ref[...], (HW, 64))

    # Zero only the vertical-pad rows of the scratch: the interior
    # [R0, R0 + HW) is fully overwritten each step, and per-step re-zeroing of
    # the pads stays correct if the batch grid is split across cores.
    pad_ref[0:R0, :] = jnp.zeros((R0, 64), jnp.float32)
    pad_ref[R0 + HW:PAD_ROWS, :] = jnp.zeros((PAD_ROWS - R0 - HW, 64),
                                             jnp.float32)

    # --- fused branch-entry 1x1 convs: 320 -> 96 = [b0 | a1 | a2] ------------
    t = jnp.dot(x_bf, w1_ref[...], preferred_element_type=jnp.float32)
    t = jnp.maximum(t + c1_ref[...], 0.0)                 # (HW, 96) f32
    b0 = t[:, 0:32]

    # --- branch1 3x3 (32->32) + branch2 first 3x3 (32->48) as ONE matmul -----
    pad_ref[pl.ds(R0, HW), :] = t[:, 32:96]               # [a1 | a2] 64 ch
    slab = _im2col_3x3(pad_ref, ml_b, mr_b, HW=HW, W=W, R0=R0)     # (HW, 576)
    ta = jnp.dot(slab, w3a_ref[...], preferred_element_type=jnp.float32)
    ta = jnp.maximum(ta + c3a_ref[...], 0.0)              # (HW, 96)=[b1|h2|0]
    b1 = ta[:, 0:32]

    # --- branch2 second 3x3 (48->64); reuse the same 64-wide scratch ---------
    pad_ref[pl.ds(R0, HW), :] = ta[:, 32:96]              # [h2 | 16 zero ch]
    slab = _im2col_3x3(pad_ref, ml_b, mr_b, HW=HW, W=W, R0=R0)     # (HW, 576)
    b2 = jnp.dot(slab, w3b_ref[...], preferred_element_type=jnp.float32)
    b2 = jnp.maximum(b2 + c3b_ref[...], 0.0)              # (HW, 64)

    # --- final 1x1 (Block35 scale folded): ONE K=128 matmul, then bias +
    # --- residual (exact f32) + ReLU ------------------------------------------
    cat = jnp.concatenate([b0.astype(jnp.bfloat16),
                           b1.astype(jnp.bfloat16),
                           b2.astype(jnp.bfloat16)], axis=-1)      # (HW, 128)
    out = jnp.dot(cat, wf_ref[...], preferred_element_type=jnp.float32)
    o_ref[...] = jnp.maximum(out + cf_ref[...] + xv, 0.0).astype(o_ref.dtype)


# ----------------------------------------------------------------------------
# Wrappers
# ----------------------------------------------------------------------------

def block35_forward_nhwc(x_nhwc, params):
    """Fused Block35 forward, NHWC in / NHWC out (I/O dtype follows input)."""
    N, H, W, C = x_nhwc.shape
    assert C == 320, "Block35 operates on 320-channel feature maps"
    HW = H * W
    R0 = _round_up(W + 1, 8)                       # aligned top pad >= W+1
    PAD_ROWS = _round_up(R0 + HW + W + 1, 8)       # enough bottom pad

    x3 = x_nhwc.reshape(N, HW, C)

    # Horizontal-boundary masks for the row-flattened 3x3 (host precomputed).
    w_idx = jnp.arange(HW, dtype=jnp.int32) % W
    mask_l = (w_idx != 0).astype(jnp.float32).reshape(HW, 1)
    mask_r = (w_idx != W - 1).astype(jnp.float32).reshape(HW, 1)

    kernel = functools.partial(_block35_kernel, HW=HW, W=W, R0=R0,
                               PAD_ROWS=PAD_ROWS)

    def full(shape):
        zeros = (0,) * len(shape)
        return pl.BlockSpec(shape, lambda n, _z=zeros: _z)

    out = pl.pallas_call(
        kernel,
        out_shape=jax.ShapeDtypeStruct((N, HW, C), x3.dtype),
        grid=(N,),
        in_specs=[
            pl.BlockSpec((None, HW, C), lambda n: (n, 0, 0)),   # x (per image)
            full((HW, 1)), full((HW, 1)),                       # edge masks
            full((C, 96)), full((1, 96)),                       # fused entry 1x1
            full((576, 96)), full((1, 96)),                     # fused 3x3 (b1 + b2a)
            full((576, 64)), full((1, 64)),                     # branch2 3x3 b
            full((128, C)), full((1, C)),                       # final 1x1
        ],
        out_specs=pl.BlockSpec((None, HW, C), lambda n: (n, 0, 0)),
        scratch_shapes=[pltpu.VMEM((PAD_ROWS, 64), jnp.float32)],
        compiler_params=pltpu.CompilerParams(
            dimension_semantics=("parallel",)),
    )(x3, mask_l, mask_r,
      params["w1"], params["c1"],
      params["w3a"], params["c3a"],
      params["w3b"], params["c3b"],
      params["wf"], params["cf"])

    return out.reshape(N, H, W, C)


def block35_forward_nchw(x_nchw, params):
    # PyTorch-layout convenience wrapper.  Do NOT use per block in a real
    # network — keep the backbone NHWC and convert once at the network edges.
    x_nhwc = jnp.transpose(x_nchw, (0, 2, 3, 1))
    return jnp.transpose(block35_forward_nhwc(x_nhwc, params), (0, 3, 1, 2))


# ----------------------------------------------------------------------------
# Parameter construction (BN folding) + pure-JAX reference
# ----------------------------------------------------------------------------

def fold_basic_conv(conv_w, gamma, beta, mean, var, eps=1e-3):
    """Fold eval-mode BN into a conv.

    conv_w: PyTorch layout (Cout, Cin, kh, kw)
    returns w: (kh*kw, Cin, Cout) f32 (tap = dh*3+dw), b: (1, Cout) f32.
    """
    cout, cin, kh, kw = conv_w.shape
    s = gamma / jnp.sqrt(var + eps)
    w = jnp.transpose(conv_w, (2, 3, 1, 0)).reshape(kh * kw, cin, cout) * s
    b = (beta - mean * s).reshape(1, cout)
    return w.astype(jnp.float32), b.astype(jnp.float32)


def init_block35_params(key, scale=0.17):
    """Random params with the exact Block35 shapes, folded/fused for the
    kernel.  Returns (kernel_params(bf16 weights), reference_params(f32))."""
    keys = iter(jax.random.split(key, 64))

    def conv_w(cout, cin, k):
        std = float((cin * k * k) ** -0.5)
        return jax.random.normal(next(keys), (cout, cin, k, k), jnp.float32) * std

    def bn(c):
        gamma = 1.0 + 0.1 * jax.random.normal(next(keys), (c,), jnp.float32)
        beta = 0.1 * jax.random.normal(next(keys), (c,), jnp.float32)
        mean = 0.1 * jax.random.normal(next(keys), (c,), jnp.float32)
        var = 0.5 + jax.nn.softplus(jax.random.normal(next(keys), (c,), jnp.float32))
        return gamma, beta, mean, var

    def basic(cout, cin, k):
        return fold_basic_conv(conv_w(cout, cin, k), *bn(cout))

    w_b0, c_b0 = basic(32, 320, 1)
    w_b1a, c_b1a = basic(32, 320, 1)
    w_b1b, c_b1b = basic(32, 32, 3)
    w_b2a, c_b2a = basic(32, 320, 1)
    w_b2b, c_b2b = basic(48, 32, 3)
    w_b2c, c_b2c = basic(64, 48, 3)

    # Fused branch-entry 1x1: 320 -> 96 = [b0 | b1a | b2a]
    w1 = jnp.concatenate([w_b0[0], w_b1a[0], w_b2a[0]], axis=-1)    # (320, 96)
    c1 = jnp.concatenate([c_b0, c_b1a, c_b2a], axis=-1)             # (1, 96)

    # Fused first 3x3s (block-diagonal): inputs [a1|a2] (64ch) ->
    # outputs [b1 (32) | h2 (48) | zero-pad (16)] (96ch).
    w3a = jnp.zeros((9, 64, 96), jnp.float32)
    w3a = w3a.at[:, 0:32, 0:32].set(w_b1b)
    w3a = w3a.at[:, 32:64, 32:80].set(w_b2b)
    w3a = w3a.reshape(9 * 64, 96)                                   # (576, 96)
    c3a = jnp.concatenate([c_b1b, c_b2b, jnp.zeros((1, 16), jnp.float32)],
                          axis=-1)                                  # (1, 96)

    # Branch2 second 3x3: inputs [h2 | 16 zero-pad channels] (64ch) -> 64ch.
    w3b = jnp.zeros((9, 64, 64), jnp.float32)
    w3b = w3b.at[:, 0:48, :].set(w_b2c)
    w3b = w3b.reshape(9 * 64, 64)                                   # (576, 64)
    c3b = c_b2c

    # Final 1x1 conv (128 -> 320) WITH bias, no BN; Block35 scale folded in.
    wf_raw = jax.random.normal(next(keys), (320, 128, 1, 1), jnp.float32) * (128 ** -0.5)
    cf_raw = 0.1 * jax.random.normal(next(keys), (320,), jnp.float32)
    wf = jnp.transpose(wf_raw, (2, 3, 1, 0)).reshape(128, 320) * scale
    cf = (cf_raw * scale).reshape(1, 320)

    ref = dict(w1=w1, c1=c1, w1b=w_b1b, c1b=c_b1b, w2b=w_b2b, c2b=c_b2b,
               w2c=w_b2c, c2c=c_b2c, wf=wf, cf=cf)
    bf16 = jnp.bfloat16
    kern = dict(w1=w1.astype(bf16), c1=c1,
                w3a=w3a.astype(bf16), c3a=c3a,
                w3b=w3b.astype(bf16), c3b=c3b,
                wf=wf.astype(bf16), cf=cf)
    return kern, ref


@jax.jit
def block35_reference_nhwc(x_nhwc, rp):
    """Pure-JAX f32 reference (same folded weights, before the bf16 cast)."""
    x = x_nhwc.astype(jnp.float32)
    relu = lambda v: jnp.maximum(v, 0.0)

    def conv3x3(v, w9, b):
        w = w9.reshape(3, 3, w9.shape[1], w9.shape[2])      # HWIO
        y = lax.conv_general_dilated(v, w, (1, 1), 'SAME',
                                     dimension_numbers=('NHWC', 'HWIO', 'NHWC'),
                                     precision=lax.Precision.HIGHEST)
        return relu(y + b.reshape(1, 1, 1, -1))

    t = relu(jnp.einsum('nhwc,cd->nhwd', x, rp['w1'],
                        precision=lax.Precision.HIGHEST)
             + rp['c1'].reshape(1, 1, 1, -1))
    b0, a1, a2 = t[..., :32], t[..., 32:64], t[..., 64:96]
    b1 = conv3x3(a1, rp['w1b'], rp['c1b'])
    b2 = conv3x3(conv3x3(a2, rp['w2b'], rp['c2b']), rp['w2c'], rp['c2c'])
    cat = jnp.concatenate([b0, b1, b2], axis=-1)
    out = (jnp.einsum('nhwc,cd->nhwd', cat, rp['wf'],
                      precision=lax.Precision.HIGHEST)
           + rp['cf'].reshape(1, 1, 1, -1) + x)
    return relu(out)


# ----------------------------------------------------------------------------
# Main
# ----------------------------------------------------------------------------

if __name__ == "__main__":
    key = jax.random.PRNGKey(0)
    k_x, k_p = jax.random.split(key)

    # Channel count (320) is fixed by the module; keep batch/spatial small.
    N, H, W, C = 2, 8, 8, 320
    x = jax.random.normal(k_x, (N, H, W, C), jnp.float32)   # NHWC (no per-block transposes)

    params, ref_params = init_block35_params(k_p, scale=0.17)

    fwd = jax.jit(block35_forward_nhwc)
    out = jax.block_until_ready(fwd(x, params))
    assert out.shape == (N, H, W, C)
    assert bool(jnp.all(jnp.isfinite(out)))

    # Correctness check vs. an f32 reference (drift comes only from the bf16
    # MXU operands; the residual path stays exact f32).
    ref = jax.block_until_ready(block35_reference_nhwc(x, ref_params))
    max_err = float(jnp.max(jnp.abs(out - ref)))
    assert max_err < 5e-2, f"max |kernel - reference| = {max_err}"

    print("KERNEL_OK")
</pallas_src>

<mosaic_0001>
module attributes {stable_mosaic.version = 11 : i64} {
  func.func @_block35_kernel(%arg0: i32, %arg1: memref<1x64x320xf32, #tpu.memory_space<vmem>>, %arg2: memref<64x1xf32, #tpu.memory_space<vmem>>, %arg3: memref<64x1xf32, #tpu.memory_space<vmem>>, %arg4: memref<320x96xbf16, #tpu.memory_space<vmem>>, %arg5: memref<1x96xf32, #tpu.memory_space<vmem>>, %arg6: memref<576x96xbf16, #tpu.memory_space<vmem>>, %arg7: memref<1x96xf32, #tpu.memory_space<vmem>>, %arg8: memref<576x64xbf16, #tpu.memory_space<vmem>>, %arg9: memref<1x64xf32, #tpu.memory_space<vmem>>, %arg10: memref<128x320xbf16, #tpu.memory_space<vmem>>, %arg11: memref<1x320xf32, #tpu.memory_space<vmem>>, %arg12: memref<1x64x320xf32, #tpu.memory_space<vmem>>, %arg13: memref<96x64xf32, #tpu.memory_space<vmem>>) attributes {dimension_semantics = [#tpu.dimension_semantics<parallel>], iteration_bounds = array<i64: 2>, scalar_prefetch = 0 : i64, scratch_operands = 1 : i64, tpu.core_type = #tpu.core_type<tc>, window_params = [{transform_indices = @transform_0, window_bounds = array<i64: 1, 64, 320>}, {pipeline_mode = #tpu.pipeline_mode<synchronous>, transform_indices = @transform_1, window_bounds = array<i64: 64, 1>}, {pipeline_mode = #tpu.pipeline_mode<synchronous>, transform_indices = @transform_2, window_bounds = array<i64: 64, 1>}, {pipeline_mode = #tpu.pipeline_mode<synchronous>, transform_indices = @transform_3, window_bounds = array<i64: 320, 96>}, {pipeline_mode = #tpu.pipeline_mode<synchronous>, transform_indices = @transform_4, window_bounds = array<i64: 1, 96>}, {pipeline_mode = #tpu.pipeline_mode<synchronous>, transform_indices = @transform_5, window_bounds = array<i64: 576, 96>}, {pipeline_mode = #tpu.pipeline_mode<synchronous>, transform_indices = @transform_6, window_bounds = array<i64: 1, 96>}, {pipeline_mode = #tpu.pipeline_mode<synchronous>, transform_indices = @transform_7, window_bounds = array<i64: 576, 64>}, {pipeline_mode = #tpu.pipeline_mode<synchronous>, transform_indices = @transform_8, window_bounds = array<i64: 1, 64>}, {pipeline_mode = #tpu.pipeline_mode<synchronous>, transform_indices = @transform_9, window_bounds = array<i64: 128, 320>}, {pipeline_mode = #tpu.pipeline_mode<synchronous>, transform_indices = @transform_10, window_bounds = array<i64: 1, 320>}, {transform_indices = @transform_11, window_bounds = array<i64: 1, 64, 320>}]} {
    %c0 = arith.constant 0 : index
    %c0_0 = arith.constant 0 : index
    %c0_1 = arith.constant 0 : index
    %0 = vector.load %arg1[%c0, %c0_0, %c0_1] : memref<1x64x320xf32, #tpu.memory_space<vmem>>, vector<1x64x320xf32>
    %1 = vector.shape_cast %0 : vector<1x64x320xf32> to vector<64x320xf32>
    %c0_2 = arith.constant 0 : index
    %c0_3 = arith.constant 0 : index
    %c0_4 = arith.constant 0 : index
    %2 = vector.load %arg1[%c0_2, %c0_3, %c0_4] : memref<1x64x320xf32, #tpu.memory_space<vmem>>, vector<1x64x320xf32>
    %3 = vector.shape_cast %2 : vector<1x64x320xf32> to vector<64x320xf32>
    %4 = arith.truncf %3 : vector<64x320xf32> to vector<64x320xbf16>
    %c0_5 = arith.constant 0 : index
    %c0_6 = arith.constant 0 : index
    %5 = vector.load %arg2[%c0_5, %c0_6] : memref<64x1xf32, #tpu.memory_space<vmem>>, vector<64x1xf32>
    %6 = vector.shape_cast %5 : vector<64x1xf32> to vector<64x1xf32>
    %7 = vector.broadcast %6 : vector<64x1xf32> to vector<64x64xf32>
    %c0_7 = arith.constant 0 : index
    %c0_8 = arith.constant 0 : index
    %8 = vector.load %arg3[%c0_7, %c0_8] : memref<64x1xf32, #tpu.memory_space<vmem>>, vector<64x1xf32>
    %9 = vector.shape_cast %8 : vector<64x1xf32> to vector<64x1xf32>
    %10 = vector.broadcast %9 : vector<64x1xf32> to vector<64x64xf32>
    %cst = arith.constant 0.000000e+00 : f32
    %11 = vector.broadcast %cst : f32 to vector<16x64xf32>
    %c0_9 = arith.constant 0 : index
    %c0_10 = arith.constant 0 : index
    %12 = vector.load %arg13[%c0_9, %c0_10] : memref<96x64xf32, #tpu.memory_space<vmem>>, vector<16x64xf32>
    tpu.vector_store %arg13[%c0_9, %c0_10], %11 {strides = array<i32>} : memref<96x64xf32, #tpu.memory_space<vmem>>, vector<16x64xf32>,
    %cst_11 = arith.constant 0.000000e+00 : f32
    %13 = vector.broadcast %cst_11 : f32 to vector<16x64xf32>
    %c80 = arith.constant 80 : index
    %c0_12 = arith.constant 0 : index
    %14 = vector.load %arg13[%c80, %c0_12] : memref<96x64xf32, #tpu.memory_space<vmem>>, vector<16x64xf32>
    tpu.vector_store %arg13[%c80, %c0_12], %13 {strides = array<i32>} : memref<96x64xf32, #tpu.memory_space<vmem>>, vector<16x64xf32>,
    %c0_13 = arith.constant 0 : index
    %c0_14 = arith.constant 0 : index
    %15 = vector.load %arg4[%c0_13, %c0_14] : memref<320x96xbf16, #tpu.memory_space<vmem>>, vector<320x96xbf16>
    %cst_15 = arith.constant dense<0.000000e+00> : vector<64x96xf32>
    %16 = tpu.matmul %4, %15, %cst_15 {dimension_numbers = #tpu.dot_dimension_numbers<[1], [0], [0], [1], [0, 0, 1, 1], [], []>} : vector<64x320xbf16>, vector<320x96xbf16>, vector<64x96xf32> -> vector<64x96xf32>
    %c0_16 = arith.constant 0 : index
    %c0_17 = arith.constant 0 : index
    %17 = vector.load %arg5[%c0_16, %c0_17] : memref<1x96xf32, #tpu.memory_space<vmem>>, vector<1x96xf32>
    %18 = vector.broadcast %17 : vector<1x96xf32> to vector<64x96xf32>
    %19 = arith.addf %16, %18 : vector<64x96xf32>
    %cst_18 = arith.constant 0.000000e+00 : f32
    %20 = vector.broadcast %cst_18 : f32 to vector<64x96xf32>
    %21 = arith.maximumf %19, %20 : vector<64x96xf32>
    %22 = vector.extract_strided_slice %21 {offsets = [0, 0], sizes = [64, 32], strides = [1, 1]} : vector<64x96xf32> to vector<64x32xf32>
    %23 = vector.extract_strided_slice %21 {offsets = [0, 32], sizes = [64, 64], strides = [1, 1]} : vector<64x96xf32> to vector<64x64xf32>
    %c16 = arith.constant 16 : index
    %c0_19 = arith.constant 0 : index
    %24 = vector.load %arg13[%c16, %c0_19] : memref<96x64xf32, #tpu.memory_space<vmem>>, vector<64x64xf32>
    tpu.vector_store %arg13[%c16, %c0_19], %23 {strides = array<i32>} : memref<96x64xf32, #tpu.memory_space<vmem>>, vector<64x64xf32>,
    %c7 = arith.constant 7 : index
    %c0_20 = arith.constant 0 : index
    %25 = vector.load %arg13[%c7, %c0_20] : memref<96x64xf32, #tpu.memory_space<vmem>>, vector<64x64xf32>
    %26 = arith.mulf %25, %7 : vector<64x64xf32>
    %27 = arith.truncf %26 : vector<64x64xf32> to vector<64x64xbf16>
    %c8 = arith.constant 8 : index
    %c0_21 = arith.constant 0 : index
    %28 = vector.load %arg13[%c8, %c0_21] : memref<96x64xf32, #tpu.memory_space<vmem>>, vector<64x64xf32>
    %29 = arith.truncf %28 : vector<64x64xf32> to vector<64x64xbf16>
    %c9 = arith.constant 9 : index
    %c0_22 = arith.constant 0 : index
    %30 = vector.load %arg13[%c9, %c0_22] : memref<96x64xf32, #tpu.memory_space<vmem>>, vector<64x64xf32>
    %31 = arith.mulf %30, %10 : vector<64x64xf32>
    %32 = arith.truncf %31 : vector<64x64xf32> to vector<64x64xbf16>
    %c15 = arith.constant 15 : index
    %c0_23 = arith.constant 0 : index
    %33 = vector.load %arg13[%c15, %c0_23] : memref<96x64xf32, #tpu.memory_space<vmem>>, vector<64x64xf32>
    %34 = arith.mulf %33, %7 : vector<64x64xf32>
    %35 = arith.truncf %34 : vector<64x64xf32> to vector<64x64xbf16>
    %c16_24 = arith.constant 16 : index
    %c0_25 = arith.constant 0 : index
    %36 = vector.load %arg13[%c16_24, %c0_25] : memref<96x64xf32, #tpu.memory_space<vmem>>, vector<64x64xf32>
    %37 = arith.truncf %36 : vector<64x64xf32> to vector<64x64xbf16>
    %c17 = arith.constant 17 : index
    %c0_26 = arith.constant 0 : index
    %38 = vector.load %arg13[%c17, %c0_26] : memref<96x64xf32, #tpu.memory_space<vmem>>, vector<64x64xf32>
    %39 = arith.mulf %38, %10 : vector<64x64xf32>
    %40 = arith.truncf %39 : vector<64x64xf32> to vector<64x64xbf16>
    %c23 = arith.constant 23 : index
    %c0_27 = arith.constant 0 : index
    %41 = vector.load %arg13[%c23, %c0_27] : memref<96x64xf32, #tpu.memory_space<vmem>>, vector<64x64xf32>
    %42 = arith.mulf %41, %7 : vector<64x64xf32>
    %43 = arith.truncf %42 : vector<64x64xf32> to vector<64x64xbf16>
    %c24 = arith.constant 24 : index
    %c0_28 = arith.constant 0 : index
    %44 = vector.load %arg13[%c24, %c0_28] : memref<96x64xf32, #tpu.memory_space<vmem>>, vector<64x64xf32>
    %45 = arith.truncf %44 : vector<64x64xf32> to vector<64x64xbf16>
    %c25 = arith.constant 25 : index
    %c0_29 = arith.constant 0 : index
    %46 = vector.load %arg13[%c25, %c0_29] : memref<96x64xf32, #tpu.memory_space<vmem>>, vector<64x64xf32>
    %47 = arith.mulf %46, %10 : vector<64x64xf32>
    %48 = arith.truncf %47 : vector<64x64xf32> to vector<64x64xbf16>
    %49 = tpu.concatenate %27, %29, %32, %35, %37, %40, %43, %45, %48 in 1 : vector<64x64xbf16>, vector<64x64xbf16>, vector<64x64xbf16>, vector<64x64xbf16>, vector<64x64xbf16>, vector<64x64xbf16>, vector<64x64xbf16>, vector<64x64xbf16>, vector<64x64xbf16> -> vector<64x576xbf16>
    %c0_30 = arith.constant 0 : index
    %c0_31 = arith.constant 0 : index
    %50 = vector.load %arg6[%c0_30, %c0_31] : memref<576x96xbf16, #tpu.memory_space<vmem>>, vector<576x96xbf16>
    %cst_32 = arith.constant dense<0.000000e+00> : vector<64x96xf32>
    %51 = tpu.matmul %49, %50, %cst_32 {dimension_numbers = #tpu.dot_dimension_numbers<[1], [0], [0], [1], [0, 0, 1, 1], [], []>} : vector<64x576xbf16>, vector<576x96xbf16>, vector<64x96xf32> -> vector<64x96xf32>
    %c0_33 = arith.constant 0 : index
    %c0_34 = arith.constant 0 : index
    %52 = vector.load %arg7[%c0_33, %c0_34] : memref<1x96xf32, #tpu.memory_space<vmem>>, vector<1x96xf32>
    %53 = vector.broadcast %52 : vector<1x96xf32> to vector<64x96xf32>
    %54 = arith.addf %51, %53 : vector<64x96xf32>
    %cst_35 = arith.constant 0.000000e+00 : f32
    %55 = vector.broadcast %cst_35 : f32 to vector<64x96xf32>
    %56 = arith.maximumf %54, %55 : vector<64x96xf32>
    %57 = vector.extract_strided_slice %56 {offsets = [0, 0], sizes = [64, 32], strides = [1, 1]} : vector<64x96xf32> to vector<64x32xf32>
    %58 = vector.extract_strided_slice %56 {offsets = [0, 32], sizes = [64, 64], strides = [1, 1]} : vector<64x96xf32> to vector<64x64xf32>
    %c16_36 = arith.constant 16 : index
    %c0_37 = arith.constant 0 : index
    %59 = vector.load %arg13[%c16_36, %c0_37] : memref<96x64xf32, #tpu.memory_space<vmem>>, vector<64x64xf32>
    tpu.vector_store %arg13[%c16_36, %c0_37], %58 {strides = array<i32>} : memref<96x64xf32, #tpu.memory_space<vmem>>, vector<64x64xf32>,
    %c7_38 = arith.constant 7 : index
    %c0_39 = arith.constant 0 : index
    %60 = vector.load %arg13[%c7_38, %c0_39] : memref<96x64xf32, #tpu.memory_space<vmem>>, vector<64x64xf32>
    %61 = arith.mulf %60, %7 : vector<64x64xf32>
    %62 = arith.truncf %61 : vector<64x64xf32> to vector<64x64xbf16>
    %c8_40 = arith.constant 8 : index
    %c0_41 = arith.constant 0 : index
    %63 = vector.load %arg13[%c8_40, %c0_41] : memref<96x64xf32, #tpu.memory_space<vmem>>, vector<64x64xf32>
    %64 = arith.truncf %63 : vector<64x64xf32> to vector<64x64xbf16>
    %c9_42 = arith.constant 9 : index
    %c0_43 = arith.constant 0 : index
    %65 = vector.load %arg13[%c9_42, %c0_43] : memref<96x64xf32, #tpu.memory_space<vmem>>, vector<64x64xf32>
    %66 = arith.mulf %65, %10 : vector<64x64xf32>
    %67 = arith.truncf %66 : vector<64x64xf32> to vector<64x64xbf16>
    %c15_44 = arith.constant 15 : index
    %c0_45 = arith.constant 0 : index
    %68 = vector.load %arg13[%c15_44, %c0_45] : memref<96x64xf32, #tpu.memory_space<vmem>>, vector<64x64xf32>
    %69 = arith.mulf %68, %7 : vector<64x64xf32>
    %70 = arith.truncf %69 : vector<64x64xf32> to vector<64x64xbf16>
    %c16_46 = arith.constant 16 : index
    %c0_47 = arith.constant 0 : index
    %71 = vector.load %arg13[%c16_46, %c0_47] : memref<96x64xf32, #tpu.memory_space<vmem>>, vector<64x64xf32>
    %72 = arith.truncf %71 : vector<64x64xf32> to vector<64x64xbf16>
    %c17_48 = arith.constant 17 : index
    %c0_49 = arith.constant 0 : index
    %73 = vector.load %arg13[%c17_48, %c0_49] : memref<96x64xf32, #tpu.memory_space<vmem>>, vector<64x64xf32>
    %74 = arith.mulf %73, %10 : vector<64x64xf32>
    %75 = arith.truncf %74 : vector<64x64xf32> to vector<64x64xbf16>
    %c23_50 = arith.constant 23 : index
    %c0_51 = arith.constant 0 : index
    %76 = vector.load %arg13[%c23_50, %c0_51] : memref<96x64xf32, #tpu.memory_space<vmem>>, vector<64x64xf32>
    %77 = arith.mulf %76, %7 : vector<64x64xf32>
    %78 = arith.truncf %77 : vector<64x64xf32> to vector<64x64xbf16>
    %c24_52 = arith.constant 24 : index
    %c0_53 = arith.constant 0 : index
    %79 = vector.load %arg13[%c24_52, %c0_53] : memref<96x64xf32, #tpu.memory_space<vmem>>, vector<64x64xf32>
    %80 = arith.truncf %79 : vector<64x64xf32> to vector<64x64xbf16>
    %c25_54 = arith.constant 25 : index
    %c0_55 = arith.constant 0 : index
    %81 = vector.load %arg13[%c25_54, %c0_55] : memref<96x64xf32, #tpu.memory_space<vmem>>, vector<64x64xf32>
    %82 = arith.mulf %81, %10 : vector<64x64xf32>
    %83 = arith.truncf %82 : vector<64x64xf32> to vector<64x64xbf16>
    %84 = tpu.concatenate %62, %64, %67, %70, %72, %75, %78, %80, %83 in 1 : vector<64x64xbf16>, vector<64x64xbf16>, vector<64x64xbf16>, vector<64x64xbf16>, vector<64x64xbf16>, vector<64x64xbf16>, vector<64x64xbf16>, vector<64x64xbf16>, vector<64x64xbf16> -> vector<64x576xbf16>
    %c0_56 = arith.constant 0 : index
    %c0_57 = arith.constant 0 : index
    %85 = vector.load %arg8[%c0_56, %c0_57] : memref<576x64xbf16, #tpu.memory_space<vmem>>, vector<576x64xbf16>
    %cst_58 = arith.constant dense<0.000000e+00> : vector<64x64xf32>
    %86 = tpu.matmul %84, %85, %cst_58 {dimension_numbers = #tpu.dot_dimension_numbers<[1], [0], [0], [1], [0, 0, 1, 1], [], []>} : vector<64x576xbf16>, vector<576x64xbf16>, vector<64x64xf32> -> vector<64x64xf32>
    %c0_59 = arith.constant 0 : index
    %c0_60 = arith.constant 0 : index
    %87 = vector.load %arg9[%c0_59, %c0_60] : memref<1x64xf32, #tpu.memory_space<vmem>>, vector<1x64xf32>
    %88 = vector.broadcast %87 : vector<1x64xf32> to vector<64x64xf32>
    %89 = arith.addf %86, %88 : vector<64x64xf32>
    %cst_61 = arith.constant 0.000000e+00 : f32
    %90 = vector.broadcast %cst_61 : f32 to vector<64x64xf32>
    %91 = arith.maximumf %89, %90 : vector<64x64xf32>
    %92 = arith.truncf %22 : vector<64x32xf32> to vector<64x32xbf16>
    %93 = arith.truncf %57 : vector<64x32xf32> to vector<64x32xbf16>
    %94 = arith.truncf %91 : vector<64x64xf32> to vector<64x64xbf16>
    %95 = tpu.concatenate %92, %93, %94 in 1 : vector<64x32xbf16>, vector<64x32xbf16>, vector<64x64xbf16> -> vector<64x128xbf16>
    %c0_62 = arith.constant 0 : index
    %c0_63 = arith.constant 0 : index
    %96 = vector.load %arg10[%c0_62, %c0_63] : memref<128x320xbf16, #tpu.memory_space<vmem>>, vector<128x320xbf16>
    %cst_64 = arith.constant dense<0.000000e+00> : vector<64x320xf32>
    %97 = tpu.matmul %95, %96, %cst_64 {dimension_numbers = #tpu.dot_dimension_numbers<[1], [0], [0], [1], [0, 0, 1, 1], [], []>} : vector<64x128xbf16>, vector<128x320xbf16>, vector<64x320xf32> -> vector<64x320xf32>
    %c0_65 = arith.constant 0 : index
    %c0_66 = arith.constant 0 : index
    %98 = vector.load %arg11[%c0_65, %c0_66] : memref<1x320xf32, #tpu.memory_space<vmem>>, vector<1x320xf32>
    %99 = vector.broadcast %98 : vector<1x320xf32> to vector<64x320xf32>
    %100 = arith.addf %97, %99 : vector<64x320xf32>
    %101 = arith.addf %100, %1 : vector<64x320xf32>
    %cst_67 = arith.constant 0.000000e+00 : f32
    %102 = vector.broadcast %cst_67 : f32 to vector<64x320xf32>
    %103 = arith.maximumf %101, %102 : vector<64x320xf32>
    %c0_68 = arith.constant 0 : index
    %c0_69 = arith.constant 0 : index
    %c0_70 = arith.constant 0 : index
    %104 = vector.load %arg12[%c0_68, %c0_69, %c0_70] : memref<1x64x320xf32, #tpu.memory_space<vmem>>, vector<1x64x320xf32>
    %105 = vector.shape_cast %104 : vector<1x64x320xf32> to vector<64x320xf32>
    %106 = vector.shape_cast %103 : vector<64x320xf32> to vector<1x64x320xf32>
    tpu.vector_store %arg12[%c0_68, %c0_69, %c0_70], %106 {strides = array<i32>} : memref<1x64x320xf32, #tpu.memory_space<vmem>>, vector<1x64x320xf32>,
    return
  }
  func.func @transform_0(%arg0: i32) -> (i32, i32, i32) {
    %c0_i32 = arith.constant 0 : i32
    %c0_i32_0 = arith.constant 0 : i32
    %c0_i32_1 = arith.constant 0 : i32
    return %arg0, %c0_i32, %c0_i32_0 : i32, i32, i32
  }
  func.func @transform_1(%arg0: i32) -> (i32, i32) {
    %c0_i32 = arith.constant 0 : i32
    %c0_i32_0 = arith.constant 0 : i32
    %c0_i32_1 = arith.constant 0 : i32
    return %c0_i32, %c0_i32_0 : i32, i32
  }
  func.func @transform_2(%arg0: i32) -> (i32, i32) {
    %c0_i32 = arith.constant 0 : i32
    %c0_i32_0 = arith.constant 0 : i32
    %c0_i32_1 = arith.constant 0 : i32
    return %c0_i32, %c0_i32_0 : i32, i32
  }
  func.func @transform_3(%arg0: i32) -> (i32, i32) {
    %c0_i32 = arith.constant 0 : i32
    %c0_i32_0 = arith.constant 0 : i32
    %c0_i32_1 = arith.constant 0 : i32
    return %c0_i32, %c0_i32_0 : i32, i32
  }
  func.func @transform_4(%arg0: i32) -> (i32, i32) {
    %c0_i32 = arith.constant 0 : i32
    %c0_i32_0 = arith.constant 0 : i32
    %c0_i32_1 = arith.constant 0 : i32
    return %c0_i32, %c0_i32_0 : i32, i32
  }
  func.func @transform_5(%arg0: i32) -> (i32, i32) {
    %c0_i32 = arith.constant 0 : i32
    %c0_i32_0 = arith.constant 0 : i32
    %c0_i32_1 = arith.constant 0 : i32
    return %c0_i32, %c0_i32_0 : i32, i32
  }
  func.func @transform_6(%arg0: i32) -> (i32, i32) {
    %c0_i32 = arith.constant 0 : i32
    %c0_i32_0 = arith.constant 0 : i32
    %c0_i32_1 = arith.constant 0 : i32
    return %c0_i32, %c0_i32_0 : i32, i32
  }
  func.func @transform_7(%arg0: i32) -> (i32, i32) {
    %c0_i32 = arith.constant 0 : i32
    %c0_i32_0 = arith.constant 0 : i32
    %c0_i32_1 = arith.constant 0 : i32
    return %c0_i32, %c0_i32_0 : i32, i32
  }
  func.func @transform_8(%arg0: i32) -> (i32, i32) {
    %c0_i32 = arith.constant 0 : i32
    %c0_i32_0 = arith.constant 0 : i32
    %c0_i32_1 = arith.constant 0 : i32
    return %c0_i32, %c0_i32_0 : i32, i32
  }
  func.func @transform_9(%arg0: i32) -> (i32, i32) {
    %c0_i32 = arith.constant 0 : i32
    %c0_i32_0 = arith.constant 0 : i32
    %c0_i32_1 = arith.constant 0 : i32
    return %c0_i32, %c0_i32_0 : i32, i32
  }
  func.func @transform_10(%arg0: i32) -> (i32, i32) {
    %c0_i32 = arith.constant 0 : i32
    %c0_i32_0 = arith.constant 0 : i32
    %c0_i32_1 = arith.constant 0 : i32
    return %c0_i32, %c0_i32_0 : i32, i32
  }
  func.func @transform_11(%arg0: i32) -> (i32, i32, i32) {
    %c0_i32 = arith.constant 0 : i32
    %c0_i32_0 = arith.constant 0 : i32
    %c0_i32_1 = arith.constant 0 : i32
    return %arg0, %c0_i32, %c0_i32_0 : i32, i32, i32
  }
}

</mosaic_0001>

<bundles_post_ra>
// kernel: block35_forward_nhwc.1
= control target key start
LH: loop header
LB: loop body
LE: loop exit
PB: predicated region body
PF: predicated region fallthrough
CT: control target
= control target key end

     0   :  { %s4895_s0 = inlined_call_operand.vmem [shape: f32[2,64,320], index: 0, kind: input, shape index: {}]   ;;  %s4896_s1 = inlined_call_operand.vmem [shape: f32[64,1], index: 1, kind: input, shape index: {}]   ;;  %s4897_s2 = inlined_call_operand.vmem [shape: f32[64,1], index: 2, kind: input, shape index: {}]   ;;  %s4898_s3 = inlined_call_operand.vmem [shape: bf16[320,96], index: 3, kind: input, shape index: {}]   ;;  %s4899_s4 = inlined_call_operand.vmem [shape: f32[1,96], index: 4, kind: input, shape index: {}]   ;;  %s4900_s5 = inlined_call_operand.vmem [shape: bf16[576,96], index: 5, kind: input, shape index: {}]   ;;  %s4901_s6 = inlined_call_operand.vmem [shape: f32[1,96], index: 6, kind: input, shape index: {}]   ;;  %s4902_s7 = inlined_call_operand.vmem [shape: bf16[576,64], index: 7, kind: input, shape index: {}]   ;;  %s4903_s8 = inlined_call_operand.vmem [shape: f32[1,64], index: 8, kind: input, shape index: {}]   ;;  %s4904_s9 = inlined_call_operand.vmem [shape: bf16[128,320], index: 9, kind: input, shape index: {}]   ;;  %s4905_s10 = inlined_call_operand.vmem [shape: f32[1,320], index: 10, kind: input, shape index: {}]   ;;  %s4906_s11 = inlined_call_operand.hbm [shape: f32[2,64,320], index: 11, kind: output, shape index: {}]  }
   0x1   :  { %4915 = sst [smem:[#allocation13_spill]] %s4895_s0 }
   0x2   :  { %16 = vsyncpa [#allocation4], 0 }
   0x3   :  { %18 = vsyncpa [#allocation4 + $0x1], 0  ;;  %s3664_s17 = smov 0   ;;  %s3666_s18 = smov 0  }
   0x4   :  { %s3668_s19 = smov 0   ;;  %s3670_s20 = smov 0  }
   0x5 LB: > { %s3685_s21 = sadd.s32 4294967295, %s3594_s20   ;;  %s2886_s22 = sadd.s32 4294967294, %s3594_s20   ;;  %s3594_s20 = sphi %s3670_s20, %s4952_s20   ;;  %s3590_s19 = sphi %s3668_s19, %s4951_s19   ;;  %s3586_s18 = sphi %s3666_s18, %s4950_s18   ;;  %s3582_s17 = sphi %s3664_s17, %s4949_s17  }
   0x6   : > { %s3689_s23 = sadd.s32 1, %s3594_s20   ;;  %s267_s24 = sadd.s32 1, %s3590_s19 }
   0x7   : > { %s264_s25 = ssub.s32 %s3594_s20, %s3689_s23  ;;  %p277_p0 = scmp.ne.s32.totalorder %s3590_s19, %s3586_s18 }
   0x8   : > { %p265_p1 = scmp.eq.s32.totalorder %s264_s25, 0  ;;  %p278_p2 = scmp.eq.s32.totalorder %s3685_s21, 1 }
   0x9   : > { %p283_p3 = scmp.ne.s32.totalorder %s3586_s18, %s3582_s17  ;;  %p284_p4 = scmp.eq.s32.totalorder %s2886_s22, 1 }
   0xa   : > { %s3700_s26 = scalar_select %p265_p1, %s3590_s19, %s267_s24  }
   0xb   : > { %p3702_p5 = por %p278_p2, %p277_p0  ;;  %p3706_p6 = por %p284_p4, %p283_p3 }
   0xc   : > { %4916 = sst [smem:[#allocation6_spill]] %s3700_s26  ;;  %p2889_p7 = scmp.ge.s32.totalorder %s3594_s20, 1 }
   0xd   : > { %p340_p8 = scmp.lt.s32.totalorder %s3594_s20, 3 }
   0xf   : > { %p341_p9 = pnand %p2889_p7, %p340_p8 }
  0x11   : > { %344 = sbr.rel (%p341_p9) target bundleno = 1662 (0x67e), region = 64 }
  0x18   : > { %v3384_v0 = vld [vmem:[%s4898_s3 + $0x40] sm:$0xff]   ;;  %v3386_v2 = vld [vmem:[%s4898_s3 + $0x48] sm:$0xff]   ;;  %v3388_v4 = vld [vmem:[%s4898_s3 + $0x50] sm:$0xff]   ;;  %p380_p10 = scmp.lt.s32.totalorder %s3685_s21, 1  ;;  %v4911_v5 = vmov 0   ;;  %s4919_s0 = sld [smem:[#allocation13_spill]] }
  0x19   : > { %v3385_v1 = vld [vmem:[%s4898_s3] sm:$0xff]   ;;  %3025 = vmatprep.subr.bf16.mxu0 %v3384_v0  ;;  %v3387_v3 = vld [vmem:[%s4898_s3 + $0x8] sm:$0xff]   ;;  %3382 = vset.pattern.permute.xlu1 %v4911_v5  ;;  %v3389_v6 = vld [vmem:[%s4898_s3 + $0x10] sm:$0xff]   ;;  %vm518_vm0 = vcmask 523264   ;;  %v3597_v63 = vmov 0.0   ;;  %s4909_s12 = smov 64  }
  0x1a   : > { %3026 = vmatpush3.bf16.msra.mxu0 %v3385_v1  ;;  %3383 = vset.pattern.permute.xlu0 %v4911_v5  ;;  %v3390_v7 = vld [vmem:[%s4898_s3 + $0x58] sm:$0xff]   ;;  %s381_s14 = scalar_select %p380_p10, %s3685_s21, 1  ;;  %v3394_v8 = vld [vmem:[%s4898_s3 + $0x80] sm:$0xff]   ;;  %v3397_v11 = vld [vmem:[%s4898_s3 + $0x88] sm:$0xff]   ;;  %520 = vst.msk [vmem:[#allocation2 + $0x8] sm:$0xff] %vm518_vm0, %v3597_v63  ;;  %vm2398_vm1 = vcmask 261120  }
  0x1b   : > { %3027 = vmatprep.subr.bf16.mxu0 %v3386_v2  ;;  %v3391_v9 = vld [vmem:[%s4898_s3 + $0x18] sm:$0xff]   ;;  %v3392_v10 = vld [vmem:[%s4898_s3 + $0x60] sm:$0xff]   ;;  %3261 = vmatprep.subr.bf16.mxu1 %v3394_v8  ;;  %v3395_v13 = vld [vmem:[%s4898_s3 + $0x68] sm:$0xff]   ;;  %519 = vst.msk [vmem:[#allocation2] sm:$0xff] %vm518_vm0, %v3597_v63  ;;  %s4925_s22 = smov 96   ;;  %s3600_s16 = smov 32  }
  0x1c   : > { %s3334_s29 = smul.u32 192, %s381_s14  ;;  %3262 = vmatpush3.bf16.msra.mxu1 %v3394_v8  ;;  %v3393_v12 = vld [vmem:[%s4898_s3 + $0x20] sm:$0xff]   ;;  %v3400_v14 = vld [vmem:[%s4898_s3 + $0x90] sm:$0xff]   ;;  %v3396_v15 = vld [vmem:[%s4898_s3 + $0x28] sm:$0xff]   ;;  %521 = vst.msk [vmem:[#allocation2 + $0x50] sm:$0xff] %vm518_vm0, %v3597_v63  ;;  %s4907_s14 = smov 96  }
  0x1d   : > { %3263 = vmatprep.subr.bf16.mxu1 %v3397_v11  ;;  %v3398_v18 = vld [vmem:[%s4898_s3 + $0x70] sm:$0xff]   ;;  %v3403_v20 = vld [vmem:[%s4898_s3 + $0x98] sm:$0xff]   ;;  %v422_v39 = vld [vmem:[%s4896_s1] sm:$0xff]  ;;  %522 = vst.msk [vmem:[#allocation2 + $0x58] sm:$0xff] %vm518_vm0, %v3597_v63  ;;  %s377_s13 = sand.u32 1, %s3586_s18   ;;  %s3601_s24 = smov [#allocation3]  }
  0x1e   : > { %3028 = vmatpush3.bf16.msra.mxu0 %v3387_v3  ;;  %s3761_s30 = scalar_lea.vmem %s4919_s0, %s3334_s29  ;;  %v3399_v26 = vld [vmem:[%s4898_s3 + $0x30] sm:$0xff]   ;;  %v3401_v27 = vld [vmem:[%s4898_s3 + $0x78] sm:$0xff]   ;;  %432 = vperm.xlu1 %3382, %v422_v39   ;;  %v423_v58 = vld [vmem:[%s4896_s1 + $0x8] sm:$0xff]  ;;  %s3333_s15 = smul.u32 192, %s377_s13 }
  0x1f   : > { %3029 = vmatprep.subr.bf16.mxu0 %v3388_v4  ;;  %v387_v16 = vld [vmem:[%s3761_s30 + $0x8] sm:$0xff]  ;;  %v390_v17 = vld [vmem:[%s3761_s30 + $0x20] sm:$0xff]  ;;  %v388_v21 = vld [vmem:[%s3761_s30 + $0x10] sm:$0xff]  ;;  %s3335_s29 = smul.u32 3072, %s3685_s21 }
  0x20   : > { %3264 = vmatpush3.bf16.msra.mxu1 %v3397_v11  ;;  %v411_v19 = vpack.c.bf16 %v390_v17, %v387_v16  ;;  %v391_v22 = vld [vmem:[%s3761_s30 + $0x28] sm:$0xff]  ;;  %v394_v24 = vld [vmem:[%s3761_s30 + $0x40] sm:$0xff]  ;;  %v397_v25 = vld [vmem:[%s3761_s30 + $0x58] sm:$0xff] }
  0x21   : > { %3265 = vmatprep.subr.bf16.mxu1 %v3400_v14  ;;  %v412_v23 = vpack.c.bf16 %v391_v22, %v388_v21  ;;  %v415_v28 = vpack.c.bf16 %v397_v25, %v394_v24  ;;  %v3402_v29 = vld [vmem:[%s4898_s3 + $0x38] sm:$0xff]   ;;  %v400_v30 = vld [vmem:[%s3761_s30 + $0x70] sm:$0xff]  ;;  %v403_v31 = vld [vmem:[%s3761_s30 + $0x88] sm:$0xff] }
  0x22   : > { %3030 = vmatpush3.bf16.msra.mxu0 %v3389_v6  ;;  %734 = vmatprep.mubr.bf16.mxu0 %v411_v19  ;;  %v386_v32 = vld [vmem:[%s3761_s30] sm:$0xff]  ;;  %v389_v33 = vld [vmem:[%s3761_s30 + $0x18] sm:$0xff]  ;;  %v418_v35 = vpack.c.bf16 %v403_v31, %v400_v30  ;;  %v396_v36 = vld [vmem:[%s3761_s30 + $0x50] sm:$0xff] }
  0x23   : > { %3031 = vmatprep.subr.bf16.mxu0 %v3390_v7  ;;  %3269 = vmatprep.mubr.msk.bf16.mxu1 %vm518_vm0, %v412_v23  ;;  %v393_v34 = vld [vmem:[%s3761_s30 + $0x38] sm:$0xff]  ;;  %v406_v37 = vld [vmem:[%s3761_s30 + $0xa0] sm:$0xff]  ;;  %v410_v40 = vpack.c.bf16 %v389_v33, %v386_v32  ;;  %v392_v43 = vld [vmem:[%s3761_s30 + $0x30] sm:$0xff] }
  0x24   : > { %3266 = vmatpush3.bf16.msra.mxu1 %v3400_v14  ;;  %v409_v38 = vld [vmem:[%s3761_s30 + $0xb8] sm:$0xff]  ;;  %v414_v41 = vpack.c.bf16 %v396_v36, %v393_v34  ;;  %v395_v44 = vld [vmem:[%s3761_s30 + $0x48] sm:$0xff]  ;;  %v402_v46 = vld [vmem:[%s3761_s30 + $0x80] sm:$0xff]  ;;  %437 = vperm.xlu1 %3382, %v423_v58  }
  0x25   : > { %3267 = vmatprep.subr.bf16.mxu1 %v3403_v20  ;;  %v421_v42 = vpack.c.bf16 %v409_v38, %v406_v37  ;;  %v399_v45 = vld [vmem:[%s3761_s30 + $0x68] sm:$0xff]  ;;  %v413_v47 = vpack.c.bf16 %v395_v44, %v392_v43  ;;  %v398_v49 = vld [vmem:[%s3761_s30 + $0x60] sm:$0xff]  ;;  %v401_v50 = vld [vmem:[%s3761_s30 + $0x78] sm:$0xff] }
  0x26   : > { %3032 = vmatpush3.bf16.msra.mxu0 %v3391_v9  ;;  %v417_v48 = vpack.c.bf16 %v402_v46, %v399_v45  ;;  %v405_v51 = vld [vmem:[%s3761_s30 + $0x98] sm:$0xff]  ;;  %v408_v52 = vld [vmem:[%s3761_s30 + $0xb0] sm:$0xff]  ;;  %v416_v53 = vpack.c.bf16 %v401_v50, %v398_v49  ;;  %v407_v56 = vld [vmem:[%s3761_s30 + $0xa8] sm:$0xff] }
  0x27   : > { %3033 = vmatprep.subr.bf16.mxu0 %v3392_v10  ;;  %v420_v54 = vpack.c.bf16 %v408_v52, %v405_v51  ;;  %v404_v55 = vld [vmem:[%s3761_s30 + $0x90] sm:$0xff]  ;;  %v2891_v2 = vld [vmem:[%s4899_s4] ss:$0 sm:$0xff]  ;;  %v429_v63 = vld [vmem:[%s4896_s1 + $0x38] sm:$0xff] }
  0x28   : > { %3268 = vmatpush3.bf16.msra.mxu1 %v3403_v20  ;;  %v419_v57 = vpack.c.bf16 %v407_v56, %v404_v55  ;;  %v424_v36 = vld [vmem:[%s4896_s1 + $0x10] sm:$0xff]  ;;  %v427_v55 = vld [vmem:[%s4896_s1 + $0x28] sm:$0xff] }
  0x2a   : > { %3034 = vmatpush3.bf16.msra.mxu0 %v3393_v12 }
  0x2b   : > { %3035 = vmatprep.subr.bf16.mxu0 %v3395_v13  ;;  %3270 = vmatmul.mubr.msk.bf16.vlgmr.msra.gmra.mrb[0].mxu1 %vm518_vm0, %v415_v28 }
  0x2c   : > { %3273 = vmatprep.mubr.msk.bf16.mxu1 %vm518_vm0, %v418_v35 }
  0x2e   : > { %3036 = vmatpush3.bf16.msra.mxu0 %v3396_v15 }
  0x2f   : > { %3037 = vmatprep.subr.bf16.mxu0 %v3398_v18 }
  0x32   : > { %3038 = vmatpush3.bf16.msra.mxu0 %v3399_v26 }
  0x33   : > { %3039 = vmatprep.subr.bf16.mxu0 %v3401_v27  ;;  %3274 = vmatmul.mubr.msk.bf16.gmra.mrb[4].mxu1 %vm518_vm0, %v421_v42 }
  0x36   : > { %3040 = vmatpush3.bf16.msra.mxu0 %v3402_v29 }
  0x39   : > { %735 = vmatmul.mubr.bf16.vlgmr.msra.gmra.mrb[0].mxu0 %v410_v40  ;;  %v425_v40 = vld [vmem:[%s4896_s1 + $0x18] sm:$0xff] }
  0x3a   : > { %742 = vmatprep.mubr.bf16.mxu0 %v414_v41 }
  0x41   : > { %743 = vmatmul.mubr.bf16.gmra.mrb[4].mxu0 %v413_v47 }
  0x42   : > { %750 = vmatprep.mubr.bf16.mxu0 %v417_v48 }
  0x49   : > { %751 = vmatmul.mubr.bf16.gmra.mrb[8].mxu0 %v416_v53 }
  0x4a   : > { %758 = vmatprep.mubr.bf16.mxu0 %v420_v54  ;;  %v426_v54 = vld [vmem:[%s4896_s1 + $0x20] sm:$0xff] }
  0x51   : > { %759 = vmatmul.mubr.bf16.gmra.mrb[12].mxu0 %v419_v57 }
  0xfe   : > { %v3271_v59 = vpop.f32.mrb[0].mxu1 }
  0xff   : > { %v801_v60 = vpop.f32.mrb[1].mxu1 }
 0x100   : > { %v3272_v61 = vpop.f32.mrb[2].mxu1 }
 0x101   : > { %v804_v62 = vpop.f32.mrb[3].mxu1 }
 0x106   : > { %v3275_v6 = vpop.f32.mrb[4].mxu1 }
 0x107   : > { %v817_v8 = vpop.f32.mrb[5].mxu1 }
 0x108   : > { %v3276_v11 = vpop.f32.mrb[6].mxu1 }
 0x109   : > { %v820_v12 = vpop.f32.mrb[7].mxu1 }
 0x10c   : > { %v3041_v0 = vpop.f32.mrb[0].mxu0 }
 0x10d   : > { %v3042_v1 = vpop.f32.mrb[1].mxu0 }
 0x10e   : > { %v3043_v3 = vadd.f32 %v3042_v1, %v3041_v0  ;;  %v3044_v4 = vpop.f32.mrb[2].mxu0  ;;  %v470_v0 = vld [vmem:[%s4897_s2] sm:$0xff]  ;;  %v471_v1 = vld [vmem:[%s4897_s2 + $0x8] sm:$0xff] }
 0x10f   : > { %v3045_v7 = vpop.f32.mrb[3].mxu0 }
 0x110   : > { %v3046_v9 = vadd.f32 %v3045_v7, %v3044_v4  ;;  %v737_v10 = vadd.f32 %v3043_v3, %v2891_v2  ;;  %v473_v3 = vld [vmem:[%s4897_s2 + $0x18] sm:$0xff]  ;;  %v474_v4 = vld [vmem:[%s4897_s2 + $0x20] sm:$0xff]  ;;  %v476_v7 = vld [vmem:[%s4897_s2 + $0x30] sm:$0xff] }
 0x112   : > { %v802_v13 = vadd.f32 %v801_v60, %v737_v10  ;;  %v740_v14 = vadd.f32 %v3046_v9, %v2891_v2  ;;  %v3404_v9 = vld [vmem:[%s4900_s5 + $0x40] sm:$0xff]  }
 0x113   : > { %v3405_v10 = vld [vmem:[%s4900_s5] sm:$0xff]   ;;  %3073 = vmatprep.subr.bf16.mxu1 %v3404_v9 }
 0x114   : > { %v832_v15 = vmax.f32 %v802_v13, 0.0  ;;  %v805_v16 = vadd.f32 %v804_v62, %v740_v14  ;;  %v3047_v17 = vpop.f32.mrb[4].mxu0  ;;  %v428_v62 = vld [vmem:[%s4896_s1 + $0x30] sm:$0xff]  ;;  %3074 = vmatpush3.bf16.msra.mxu1 %v3405_v10 }
 0x115   : > { %v3048_v18 = vpop.f32.mrb[5].mxu0  ;;  %v3408_v13 = vld [vmem:[%s4900_s5 + $0x50] sm:$0xff]  }
 0x116   : > { %v833_v19 = vmax.f32 %v805_v16, 0.0  ;;  %v3049_v20 = vadd.f32 %v3048_v18, %v3047_v17  ;;  %v3050_v21 = vpop.f32.mrb[6].mxu0  ;;  %848 = vrot.lane.b32.xlu0 %v832_v15, %s4907_s14  ;;  %v3409_v14 = vld [vmem:[%s4900_s5 + $0x10] sm:$0xff]   ;;  %v3411_v16 = vld [vmem:[%s4900_s5 + $0x18] sm:$0xff]   ;;  %v3412_v17 = vld [vmem:[%s4900_s5 + $0x60] sm:$0xff]  }
 0x117   : > { %v3051_v22 = vpop.f32.mrb[7].mxu0  ;;  %v3413_v18 = vld [vmem:[%s4900_s5 + $0x20] sm:$0xff]  }
 0x118   : > { %v3823_v23 = vpack.c.bf16 %v833_v19, %v832_v15  ;;  %v745_v24 = vadd.f32 %v3049_v20, %v2891_v2  ;;  %v3052_v25 = vadd.f32 %v3051_v22, %v3050_v21  ;;  %v3410_v15 = vld [vmem:[%s4900_s5 + $0x58] sm:$0xff]   ;;  %v3415_v20 = vld [vmem:[%s4900_s5 + $0x28] sm:$0xff]   ;;  %v3916_v21 = vpop.permute.xlu1 %432  ;;  %v3416_v22 = vld [vmem:[%s4900_s5 + $0x70] sm:$0xff]  }
 0x11a   : > { %4920 = vst [vmem:[#allocation7_spill] sm:$0xff] %v3823_v23  ;;  %v748_v26 = vadd.f32 %v3052_v25, %v2891_v2  ;;  %850 = vrot.lane.b32.xlu0 %v833_v19, %s4907_s14  ;;  %v810_v27 = vadd.f32 %v3271_v59, %v745_v24  ;;  %v3414_v19 = vld [vmem:[%s4900_s5 + $0x68] sm:$0xff]   ;;  %v3417_v24 = vld [vmem:[%s4900_s5 + $0x30] sm:$0xff]   ;;  %v3418_v25 = vld [vmem:[%s4900_s5 + $0x78] sm:$0xff]  }
 0x11c   : > { %v3053_v28 = vpop.f32.mrb[8].mxu0  ;;  %v834_v29 = vmax.f32 %v810_v27, 0.0  ;;  %v813_v30 = vadd.f32 %v3272_v61, %v748_v26  ;;  %v3419_v27 = vld [vmem:[%s4900_s5 + $0x38] sm:$0xff]  }
 0x11d   : > { %v3054_v31 = vpop.f32.mrb[9].mxu0 }
 0x11e   : > { %v3055_v32 = vadd.f32 %v3054_v31, %v3053_v28  ;;  %v3056_v33 = vpop.f32.mrb[10].mxu0  ;;  %852 = vrot.lane.b32.xlu0 %v834_v29, %s4907_s14  ;;  %v835_v34 = vmax.f32 %v813_v30, 0.0  ;;  %v3934_v30 = vld [vmem:[#allocation2 + $0x8] sm:$0xff]  ;;  %v3420_v31 = vld [vmem:[%s4900_s5 + $0xc0] sm:$0xff]  }
 0x11f   : > { %v3057_v35 = vpop.f32.mrb[11].mxu0  ;;  %3113 = vmatprep.subr.bf16.mxu0 %v3420_v31 }
 0x120   : > { %v753_v37 = vadd.f32 %v3055_v32, %v2891_v2  ;;  %v3058_v38 = vadd.f32 %v3057_v35, %v3056_v33  ;;  %854 = vrot.lane.b32.xlu1 %v835_v34, %s4907_s14  ;;  %v3831_v39 = vpack.c.bf16 %v835_v34, %v834_v29  ;;  %v3931_v29 = vpop.permute.xlu1 %437  ;;  %v3421_v32 = vld [vmem:[%s4900_s5 + $0x80] sm:$0xff]   ;;  %v3422_v33 = vld [vmem:[%s4900_s5 + $0xc8] sm:$0xff]  }
 0x121   : > { %3114 = vmatpush3.bf16.msra.mxu0 %v3421_v32 }
 0x122   : > { %4921 = vst [vmem:[#allocation8_spill] sm:$0xff] %v3831_v39  ;;  %v818_v41 = vadd.f32 %v817_v8, %v753_v37  ;;  %v756_v42 = vadd.f32 %v3058_v38, %v2891_v2  ;;  %442 = vperm.xlu0 %3383, %v424_v36   ;;  %v477_v8 = vld [vmem:[%s4897_s2 + $0x38] sm:$0xff]  ;;  %v3953_v37 = vld [vmem:[%s4900_s5 + $0x100] sm:$0xff]   ;;  %3115 = vmatprep.subr.bf16.mxu0 %v3422_v33 }
 0x124   : > { %v821_v43 = vadd.f32 %v820_v12, %v756_v42  ;;  %v3059_v44 = vpop.f32.mrb[12].mxu0  ;;  %447 = vperm.xlu1 %3382, %v425_v40   ;;  %v836_v46 = vmax.f32 %v818_v41, 0.0  ;;  %v3407_v12 = vld [vmem:[%s4900_s5 + $0x8] sm:$0xff]  }
 0x125   : > { %v3060_v45 = vpop.f32.mrb[13].mxu0  ;;  %v3424_v41 = vld [vmem:[%s4900_s5 + $0x88] sm:$0xff]  }
 0x126   : > { %v837_v47 = vmax.f32 %v821_v43, 0.0  ;;  %v3061_v48 = vadd.f32 %v3060_v45, %v3059_v44  ;;  %v3062_v49 = vpop.f32.mrb[14].mxu0  ;;  %3116 = vmatpush3.bf16.msra.mxu0 %v3424_v41 }
 0x127   : > { %v3063_v50 = vpop.f32.mrb[15].mxu0 }
 0x128   : > { %v3836_v51 = vpack.c.bf16 %v837_v47, %v836_v46  ;;  %v761_v52 = vadd.f32 %v3061_v48, %v2891_v2  ;;  %v3064_v53 = vadd.f32 %v3063_v50, %v3062_v49  ;;  %856 = vrot.lane.b32.xlu1 %v836_v46, %s4907_s14  ;;  %858 = vrot.lane.b32.xlu0 %v837_v47, %s4907_s14  ;;  %v3425_v49 = vld [vmem:[%s4900_s5 + $0xd0] sm:$0xff]  }
 0x129   : > { %v3426_v50 = vld [vmem:[%s4900_s5 + $0x90] sm:$0xff]   ;;  %3117 = vmatprep.subr.bf16.mxu0 %v3425_v49 }
 0x12a   : > { %4922 = vst [vmem:[#allocation9_spill] sm:$0xff] %v3836_v51  ;;  %v764_v56 = vadd.f32 %v3064_v53, %v2891_v2  ;;  %v826_v57 = vadd.f32 %v3275_v6, %v761_v52  ;;  %v472_v2 = vld [vmem:[%s4897_s2 + $0x10] sm:$0xff]  ;;  %v475_v6 = vld [vmem:[%s4897_s2 + $0x28] sm:$0xff]  ;;  %v3427_v52 = vld [vmem:[%s4900_s5 + $0xd8] sm:$0xff]   ;;  %3118 = vmatpush3.bf16.msra.mxu0 %v3426_v50 }
 0x12b   : > { %v3429_v53 = vld [vmem:[%s4900_s5 + $0x98] sm:$0xff]   ;;  %3119 = vmatprep.subr.bf16.mxu0 %v3427_v52 }
 0x12c   : > { %452 = vperm.xlu1 %3382, %v426_v54   ;;  %457 = vperm.xlu0 %3383, %v427_v55   ;;  %v829_v58 = vadd.f32 %v3276_v11, %v764_v56  ;;  %v838_v59 = vmax.f32 %v826_v57, 0.0  ;;  %v3406_v11 = vld [vmem:[%s4900_s5 + $0x48] sm:$0xff]   ;;  %v3430_v54 = vld [vmem:[%s4900_s5 + $0xe0] sm:$0xff]  }
 0x12d   : > { %3075 = vmatprep.subr.bf16.mxu1 %v3406_v11 }
 0x12e   : > { %v839_v60 = vmax.f32 %v829_v58, 0.0  ;;  %3076 = vmatpush3.bf16.msra.mxu1 %v3407_v12  ;;  %3120 = vmatpush3.bf16.msra.mxu0 %v3429_v53 }
 0x12f   : > { %3077 = vmatprep.subr.bf16.mxu1 %v3408_v13  ;;  %3121 = vmatprep.subr.bf16.mxu0 %v3430_v54 }
 0x130   : > { %860 = vrot.lane.b32.xlu1 %v838_v59, %s4907_s14  ;;  %v3847_v61 = vpack.c.bf16 %v839_v60, %v838_v59  ;;  %862 = vrot.lane.b32.xlu0 %v839_v60, %s4907_s14  ;;  %s4848_s14 = scalar_lea.hbm %s4906_s11, %s3335_s29 }
 0x132   : > { %4923 = vst [vmem:[#allocation10_spill] sm:$0xff] %v3847_v61  ;;  %3078 = vmatpush3.bf16.msra.mxu1 %v3409_v14 }
 0x133   : > { %3079 = vmatprep.subr.bf16.mxu1 %v3410_v15 }
 0x134   : > { %462 = vperm.xlu1 %3382, %v428_v62   ;;  %467 = vperm.xlu0 %3383, %v429_v63   ;;  %v3431_v62 = vld [vmem:[%s4900_s5 + $0xa0] sm:$0xff]  }
 0x135   : > { %3122 = vmatpush3.bf16.msra.mxu0 %v3431_v62  ;;  %v4091_v62 = vld [vmem:[#allocation2 + $0x50] sm:$0xff] }
 0x136   : > { %3080 = vmatpush3.bf16.msra.mxu1 %v3411_v16 }
 0x137   : > { %3081 = vmatprep.subr.bf16.mxu1 %v3412_v17 }
 0x138   : > { %480 = vperm.xlu1 %3382, %v470_v0   ;;  %485 = vperm.xlu0 %3383, %v471_v1  }
 0x13a   : > { %3082 = vmatpush3.bf16.msra.mxu1 %v3413_v18  ;;  %v3437_v18 = vld [vmem:[%s4900_s5 + $0xf8] sm:$0xff]  }
 0x13b   : > { %3083 = vmatprep.subr.bf16.mxu1 %v3414_v19  ;;  %v3439_v19 = vld [vmem:[%s4900_s5 + $0xb8] sm:$0xff]  }
 0x13c   : > { %490 = vperm.xlu1 %3382, %v472_v2   ;;  %495 = vperm.xlu0 %3383, %v473_v3   ;;  %v3432_v2 = vld [vmem:[%s4900_s5 + $0xe8] sm:$0xff]  }
 0x13d   : > { %v3434_v3 = vld [vmem:[%s4900_s5 + $0xa8] sm:$0xff]   ;;  %3123 = vmatprep.subr.bf16.mxu0 %v3432_v2 }
 0x13e   : > { %3084 = vmatpush3.bf16.msra.mxu1 %v3415_v20  ;;  %3124 = vmatpush3.bf16.msra.mxu0 %v3434_v3 }
 0x13f   : > { %3085 = vmatprep.subr.bf16.mxu1 %v3416_v22 }
 0x140   : > { %500 = vperm.xlu1 %3382, %v474_v4   ;;  %505 = vperm.xlu0 %3383, %v475_v6   ;;  %v3435_v4 = vld [vmem:[%s4900_s5 + $0xf0] sm:$0xff]  }
 0x141   : > { %3125 = vmatprep.subr.bf16.mxu0 %v3435_v4 }
 0x142   : > { %3086 = vmatpush3.bf16.msra.mxu1 %v3417_v24 }
 0x143   : > { %3087 = vmatprep.subr.bf16.mxu1 %v3418_v25 }
 0x144   : > { %510 = vperm.xlu1 %3382, %v476_v7   ;;  %515 = vperm.xlu0 %3383, %v477_v8   ;;  %v3436_v8 = vld [vmem:[%s4900_s5 + $0xb0] sm:$0xff]  }
 0x145   : > { %3126 = vmatpush3.bf16.msra.mxu0 %v3436_v8 }
 0x146   : > { %3088 = vmatpush3.bf16.msra.mxu1 %v3419_v27  ;;  %3127 = vmatprep.subr.bf16.mxu0 %v3437_v18 }
 0x147   : > { %3277 = vmatprep.subr.bf16.mxu1 %v3953_v37 }
 0x149   : > { %3128 = vmatpush3.bf16.msra.mxu0 %v3439_v19 }
 0x188   : > { %v849_v26 = vpop.permute.xlu0 %848 }
 0x189   : > { %872 = vst.msk [vmem:[#allocation2 + $0x10] sm:$0xff] %vm518_vm0, %v849_v26 }
 0x18c   : > { %v851_v28 = vpop.permute.xlu0 %850 }
 0x18d   : > { %873 = vst.msk [vmem:[#allocation2 + $0x18] sm:$0xff] %vm518_vm0, %v851_v28 }
 0x190   : > { %v853_v34 = vpop.permute.xlu0 %852  ;;  %v3945_v35 = vld [vmem:[#allocation2 + $0x10] sm:$0xff] }
 0x191   : > { %874 = vst.msk [vmem:[#allocation2 + $0x20] sm:$0xff] %vm518_vm0, %v853_v34  ;;  %v908_v36 = vpack.c.bf16 %v3945_v35, %v3934_v30  ;;  %v3955_v40 = vld [vmem:[#allocation2 + $0xf] sm:$0xff] }
 0x192   : > { %v855_v38 = vpop.permute.xlu1 %854  ;;  %v933_v43 = vmul.f32 %v3955_v40, %v3916_v21 }
 0x193   : > { %875 = vst.msk [vmem:[#allocation2 + $0x28] sm:$0xff] %vm518_vm0, %v855_v38  ;;  %995 = vrot.lane.b32.xlu0 %v908_v36, %s4909_s12 }
 0x194   : > { %v3962_v42 = vld [vmem:[#allocation2 + $0x17] sm:$0xff] }
 0x195   : > { %v934_v44 = vmul.f32 %v3962_v42, %v3931_v29  ;;  %v3969_v46 = vld [vmem:[#allocation2 + $0x18] sm:$0xff] }
 0x196   : > { %v913_v38 = vld [vmem:[#allocation2 + $0x11] sm:$0xff] }
 0x197   : > { %v941_v45 = vpack.c.bf16 %v934_v44, %v933_v43 }
 0x198   : > { %v3971_v47 = vld [vmem:[#allocation2 + $0x20] sm:$0xff] }
 0x199   : > { %1007 = vrot.lane.b32.xlu1 %v941_v45, %s4909_s12  ;;  %v909_v48 = vpack.c.bf16 %v3971_v47, %v3969_v46  ;;  %v3996_v57 = vld [vmem:[#allocation2 + $0x1f] sm:$0xff] }
 0x19a   : > { %v3998_v58 = vld [vmem:[#allocation2 + $0x27] sm:$0xff]  ;;  %v4072_v41 = vld [vmem:[#allocation2 + $0x19] sm:$0xff] }
 0x19b   : > { %997 = vrot.lane.b32.xlu0 %v909_v48, %s4909_s12  ;;  %s4924_s12 = smov 64   ;;  %v4026_v9 = vld [vmem:[#allocation2 + $0x28] sm:$0xff] }
 0x19c   : > { %v4084_v52 = vld [vmem:[#allocation2 + $0x21] sm:$0xff] }
 0x1a1   : > { %v3992_v55 = vpop.permute.xlu0 %442 }
 0x1a2   : > { %v935_v59 = vmul.f32 %v3996_v57, %v3992_v55 }
 0x1a3   : > { %v3994_v56 = vpop.permute.xlu1 %447 }
 0x1a4   : > { %v936_v60 = vmul.f32 %v3998_v58, %v3994_v56 }
 0x1a5   : > { %v859_v63 = vpop.permute.xlu0 %858 }
 0x1a6   : > { %877 = vst.msk [vmem:[#allocation2 + $0x38] sm:$0xff] %vm518_vm0, %v859_v63  ;;  %v942_v0 = vpack.c.bf16 %v936_v60, %v935_v59 }
 0x1a7   : > { %v857_v1 = vpop.permute.xlu1 %856 }
 0x1a8   : > { %876 = vst.msk [vmem:[#allocation2 + $0x30] sm:$0xff] %vm518_vm0, %v857_v1  ;;  %1009 = vrot.lane.b32.xlu1 %v942_v0, %s4924_s12 }
 0x1ab   : > { %v4019_v6 = vpop.permute.xlu1 %452  ;;  %v4021_v7 = vpop.permute.xlu0 %457 }
 0x1ad   : > { %v4054_v25 = vld [vmem:[#allocation2 + $0x38] sm:$0xff] }
 0x1af   : > { %v861_v10 = vpop.permute.xlu1 %860  ;;  %v863_v11 = vpop.permute.xlu0 %862  ;;  %v4028_v12 = vld [vmem:[#allocation2 + $0x30] sm:$0xff] }
 0x1b0   : > { %v4030_v13 = vld [vmem:[#allocation2 + $0x2f] sm:$0xff]  ;;  %v4032_v14 = vld [vmem:[#allocation2 + $0x37] sm:$0xff]  ;;  %878 = vst.msk [vmem:[#allocation2 + $0x40] sm:$0xff] %vm518_vm0, %v861_v10  ;;  %879 = vst.msk [vmem:[#allocation2 + $0x48] sm:$0xff] %vm518_vm0, %v863_v11  ;;  %v910_v15 = vpack.c.bf16 %v4028_v12, %v4026_v9 }
 0x1b1   : > { %v937_v16 = vmul.f32 %v4030_v13, %v4019_v6  ;;  %v938_v17 = vmul.f32 %v4032_v14, %v4021_v7  ;;  %v4078_v48 = vld [vmem:[#allocation2 + $0x29] sm:$0xff]  ;;  %v4093_v63 = vld [vmem:[#allocation2 + $0x31] sm:$0xff] }
 0x1b2   : > { %999 = vrot.lane.b32.xlu0 %v910_v15, %s4924_s12 }
 0x1b3   : > { %v943_v20 = vpack.c.bf16 %v938_v17, %v937_v16  ;;  %v4049_v22 = vpop.permute.xlu1 %462  ;;  %v4051_v24 = vpop.permute.xlu0 %467 }
 0x1b5   : > { %1011 = vrot.lane.b32.xlu1 %v943_v20, %s4924_s12 }
 0x1b7   : > { %v4056_v26 = vpop.permute.xlu1 %480  ;;  %v4058_v27 = vpop.permute.xlu0 %485  ;;  %v4060_v28 = vld [vmem:[#allocation2 + $0x40] sm:$0xff]  ;;  %v4099_v2 = vld [vmem:[#allocation2 + $0x48] sm:$0xff] }
 0x1b8   : > { %v4062_v31 = vld [vmem:[#allocation2 + $0x3f] sm:$0xff]  ;;  %v4064_v32 = vld [vmem:[#allocation2 + $0x47] sm:$0xff]  ;;  %v911_v33 = vpack.c.bf16 %v4060_v28, %v4054_v25  ;;  %v951_v44 = vmul.f32 %v913_v38, %v4056_v26  ;;  %v952_v45 = vmul.f32 %v4072_v41, %v4058_v27  ;;  %v977_v10 = vpack.c.bf16 %v4091_v62, %v4099_v2 }
 0x1b9   : > { %v939_v34 = vmul.f32 %v4062_v31, %v4049_v22  ;;  %v940_v36 = vmul.f32 %v4064_v32, %v4051_v24  ;;  %v4101_v3 = vld [vmem:[#allocation2 + $0x39] sm:$0xff]  ;;  %v4115_v17 = vld [vmem:[#allocation2 + $0x41] sm:$0xff]  ;;  %v4117_v18 = vld [vmem:[#allocation2 + $0x49] sm:$0xff] }
 0x1ba   : > { %1001 = vrot.lane.b32.xlu0 %v911_v33, %s4924_s12  ;;  %v959_v59 = vpack.c.bf16 %v952_v45, %v951_v44  ;;  %v921_v44 = vmul.f32 %v913_v38, %v4058_v27 }
 0x1bb   : > { %v944_v43 = vpack.c.bf16 %v940_v36, %v939_v34  ;;  %v4080_v49 = vpop.permute.xlu1 %490  ;;  %v4082_v50 = vpop.permute.xlu0 %495  ;;  %v880_v34 = vld [vmem:[#allocation2 + $0x7] sm:$0xff] }
 0x1bc   : > { %v953_v53 = vmul.f32 %v4084_v52, %v4080_v49  ;;  %v954_v54 = vmul.f32 %v4078_v48, %v4082_v50  ;;  %v912_v36 = vld [vmem:[#allocation2 + $0x9] sm:$0xff]  ;;  %v4129_v45 = vmul.f32 %v880_v34, %v3916_v21 }
 0x1bd   : > { %1013 = vrot.lane.b32.xlu1 %v944_v43, %s4924_s12  ;;  %v920_v43 = vmul.f32 %v912_v36, %v4056_v26  ;;  %v3433_v34 = vld [vmem:[%s4900_s5 + $0x110] sm:$0xff]   ;;  %v3438_v36 = vld [vmem:[%s4900_s5 + $0x118] sm:$0xff]  }
 0x1be   : > { %v960_v60 = vpack.c.bf16 %v954_v54, %v953_v53  ;;  %v889_v53 = vmul.f32 %v3955_v40, %v3931_v29  ;;  %v965_v54 = vmul.f32 %v3996_v57, %v3931_v29 }
 0x1bf   : > { %v4095_v0 = vpop.permute.xlu1 %500  ;;  %v4097_v1 = vpop.permute.xlu0 %505 }
 0x1c0   : > { %1021 = vrot.lane.b32.xlu0 %v960_v60, %s4924_s12  ;;  %v955_v4 = vmul.f32 %v4093_v63, %v4095_v0  ;;  %v956_v8 = vmul.f32 %v4101_v3, %v4097_v1  ;;  %v928_v60 = vpack.c.bf16 %v921_v44, %v920_v43  ;;  %v922_v43 = vmul.f32 %v4072_v41, %v4080_v49 }
 0x1c1   : > { %1019 = vrot.lane.b32.xlu1 %v959_v59, %s4924_s12  ;;  %v923_v44 = vmul.f32 %v4084_v52, %v4082_v50 }
 0x1c2   : > { %v961_v11 = vpack.c.bf16 %v956_v8, %v955_v4  ;;  %v964_v4 = vmul.f32 %v3962_v42, %v3916_v21  ;;  %v896_v8 = vpack.c.bf16 %v889_v53, %v4129_v45  ;;  %v890_v53 = vmul.f32 %v3962_v42, %v3992_v55 }
 0x1c3   : > { %v4111_v15 = vpop.permute.xlu1 %510  ;;  %v4113_v16 = vpop.permute.xlu0 %515  ;;  %v893_v42 = vmul.f32 %v4030_v13, %v4021_v7 }
 0x1c4   : > { %1028 = vrot.lane.b32.xlu0 %v977_v10, %s4924_s12  ;;  %v957_v19 = vmul.f32 %v4115_v17, %v4111_v15  ;;  %v958_v20 = vmul.f32 %v4117_v18, %v4113_v16  ;;  %v972_v38 = vpack.c.bf16 %v965_v54, %v964_v4  ;;  %v929_v54 = vpack.c.bf16 %v923_v44, %v922_v43 }
 0x1c5   : > { %1023 = vrot.lane.b32.xlu1 %v961_v11, %s4924_s12  ;;  %v927_v43 = vmul.f32 %v4115_v17, %v4113_v16  ;;  %v895_v44 = vmul.f32 %v4062_v31, %v4051_v24 }
 0x1c6   : > { %v962_v33 = vpack.c.bf16 %v958_v20, %v957_v19  ;;  %v3428_v19 = vld [vmem:[%s4900_s5 + $0x108] sm:$0xff]  }
 0x1c9   : > { %1025 = vrot.lane.b32.xlu1 %v962_v33, %s4924_s12 }
 0x205   : > { %v996_v59 = vpop.permute.xlu0 %995 }
 0x206   : > { %v1032_v40 = vsel %vm518_vm0, %v896_v8, %v996_v59 }
 0x20b   : > { %v1008_v10 = vpop.permute.xlu1 %1007 }
 0x20c   : > { %v1048_v11 = vsel %vm518_vm0, %v928_v60, %v1008_v10  ;;  %v924_v10 = vmul.f32 %v4078_v48, %v4095_v0 }
 0x20d   : > { %1430 = vmatprep.mubr.bf16.mxu1 %v1048_v11  ;;  %v998_v20 = vpop.permute.xlu0 %997  ;;  %v892_v11 = vmul.f32 %v3998_v58, %v4019_v6 }
 0x20e   : > { %1431 = vmatmul.mubr.bf16.vlgmr.msra.gmra.mrb[8].mxu1 %v1032_v40  ;;  %v1079_v33 = vsel %vm518_vm0, %v972_v38, %v998_v20 }
 0x20f   : > { %1495 = vmatprep.mubr.bf16.mxu0 %v1079_v33  ;;  %3278 = vmatpush3.bf16.msra.mxu1 %v3953_v37  ;;  %v891_v37 = vmul.f32 %v3996_v57, %v3994_v56  ;;  %v925_v57 = vmul.f32 %v4093_v63, %v4097_v1  ;;  %v898_v33 = vpack.c.bf16 %v893_v42, %v892_v11 }
 0x210   : > { %3279 = vmatprep.subr.bf16.mxu1 %v3428_v19 }
 0x211   : > { %v897_v60 = vpack.c.bf16 %v891_v37, %v890_v53  ;;  %v894_v37 = vmul.f32 %v4032_v14, %v4049_v22  ;;  %v979_v53 = vmul.f32 %v4072_v41, %v4056_v26  ;;  %v946_v41 = vpack.c.bf16 %v3969_v46, %v3945_v35 }
 0x212   : > { %v984_v35 = vmul.f32 %v4115_v17, %v4097_v1  ;;  %v969_v46 = vmul.f32 %v4062_v31, %v4021_v7  ;;  %v985_v31 = vmul.f32 %v4117_v18, %v4111_v15  ;;  %v948_v18 = vpack.c.bf16 %v4054_v25, %v4028_v12 }
 0x213   : > { %3280 = vmatpush3.bf16.msra.mxu1 %v3428_v19  ;;  %v1036_v8 = vsel %vm518_vm0, %v897_v60, %v998_v20  ;;  %v930_v19 = vpack.c.bf16 %v925_v57, %v924_v10  ;;  %v967_v10 = vmul.f32 %v4030_v13, %v3994_v56  ;;  %v981_v13 = vmul.f32 %v4078_v48, %v4080_v49 }
 0x214   : > { %3281 = vmatprep.subr.bf16.mxu1 %v3433_v34 }
 0x217   : > { %3282 = vmatpush3.bf16.msra.mxu1 %v3433_v34 }
 0x218   : > { %3283 = vmatprep.subr.bf16.mxu1 %v3438_v36 }
 0x21a   : > { %v1010_v59 = vpop.permute.xlu1 %1009 }
 0x21b   : > { %v1052_v4 = vsel %vm518_vm0, %v929_v54, %v1010_v59  ;;  %3284 = vmatpush3.bf16.msra.mxu1 %v3438_v36  ;;  %v926_v36 = vmul.f32 %v4101_v3, %v4111_v15  ;;  %v980_v54 = vmul.f32 %v4084_v52, %v4058_v27 }
 0x21c   : > { %1438 = vmatprep.mubr.bf16.mxu1 %v1052_v4 }
 0x21d   : > { %1439 = vmatmul.mubr.bf16.gmra.mrb[12].mxu1 %v1036_v8  ;;  %v931_v60 = vpack.c.bf16 %v927_v43, %v926_v36  ;;  %v899_v8 = vpack.c.bf16 %v895_v44, %v894_v37  ;;  %v987_v11 = vpack.c.bf16 %v980_v54, %v979_v53  ;;  %v978_v44 = vld [vmem:[#allocation2 + $0x51] sm:$0xff]  ;;  %v970_v54 = vmul.f32 %v4064_v32, %v4049_v22 }
 0x21e   : > { %v4214_v37 = vmul.f32 %v978_v44, %v4113_v16  ;;  %v963_v53 = vld [vmem:[#allocation2 + $0x4f] sm:$0xff]  ;;  %v949_v32 = vpack.c.bf16 %v4099_v2, %v4060_v28  ;;  %v4232_v44 = vld [vmem:[%s4901_s6] ss:$0 sm:$0xff] }
 0x224   : > { %v1000_v38 = vpop.permute.xlu0 %999 }
 0x225   : > { %v1040_v20 = vsel %vm518_vm0, %v898_v33, %v1000_v38  ;;  %v982_v33 = vmul.f32 %v4093_v63, %v4082_v50  ;;  %v968_v63 = vmul.f32 %v4032_v14, %v4019_v6 }
 0x227   : > { %v1012_v40 = vpop.permute.xlu1 %1011  ;;  %v988_v36 = vpack.c.bf16 %v982_v33, %v981_v13 }
 0x228   : > { %v1056_v34 = vsel %vm518_vm0, %v930_v19, %v1012_v40  ;;  %v966_v19 = vmul.f32 %v3998_v58, %v3992_v55  ;;  %v983_v58 = vmul.f32 %v4101_v3, %v4095_v0  ;;  %v974_v3 = vpack.c.bf16 %v969_v46, %v968_v63 }
 0x229   : > { %1446 = vmatprep.mubr.bf16.mxu1 %v1056_v34 }
 0x22a   : > { %1447 = vmatmul.mubr.bf16.gmra.mrb[16].mxu1 %v1040_v20  ;;  %v973_v40 = vpack.c.bf16 %v967_v10, %v966_v19  ;;  %v989_v43 = vpack.c.bf16 %v984_v35, %v983_v58 }
 0x22c   : > { %v1002_v59 = vpop.permute.xlu0 %1001  ;;  %v1082_v20 = vsel %vm518_vm0, %v973_v40, %v1000_v38  ;;  %v947_v38 = vpack.c.bf16 %v4026_v9, %v3971_v47  ;;  %v971_v47 = vmul.f32 %v963_v53, %v4051_v24  ;;  %v990_v9 = vpack.c.bf16 %v4214_v37, %v985_v31 }
 0x22d   : > { %v1044_v42 = vsel %vm518_vm0, %v899_v8, %v1002_v59  ;;  %v1085_v14 = vsel %vm518_vm0, %v974_v3, %v1002_v59 }
 0x22e   : > { %v975_v8 = vpack.c.bf16 %v971_v47, %v970_v54 }
 0x22f   : > { %v1014_v4 = vpop.permute.xlu1 %1013 }
 0x230   : > { %v1060_v57 = vsel %vm518_vm0, %v931_v60, %v1014_v4 }
 0x231   : > { %1454 = vmatprep.mubr.bf16.mxu1 %v1060_v57 }
 0x232   : > { %1455 = vmatmul.mubr.bf16.gmra.mrb[20].mxu1 %v1044_v42  ;;  %v1022_v48 = vpop.permute.xlu0 %1021 }
 0x233   : > { %v1020_v52 = vpop.permute.xlu1 %1019  ;;  %3285 = vmatprep.mubr.msk.bf16.mxu1 %vm518_vm0, %v987_v11  ;;  %v1068_v17 = vsel %vm518_vm0, %v947_v38, %v1022_v48 }
 0x234   : > { %v1064_v34 = vsel %vm518_vm0, %v946_v41, %v1020_v52 }
 0x235   : > { %1496 = vmatmul.mubr.bf16.vlgmr.msra.gmra.mrb[16].mxu0 %v1064_v34 }
 0x236   : > { %1503 = vmatprep.mubr.bf16.mxu0 %v1082_v20  ;;  %v1029_v4 = vpop.permute.xlu0 %1028 }
 0x237   : > { %v1024_v60 = vpop.permute.xlu1 %1023  ;;  %v1089_v59 = vsel %vm518_vm0, %v975_v8, %v1029_v4 }
 0x238   : > { %v1072_v10 = vsel %vm518_vm0, %v948_v18, %v1024_v60 }
 0x23a   : > { %3286 = vmatmul.mubr.msk.bf16.vlgmr.msra.gmra.mrb[24].mxu1 %vm518_vm0, %v988_v36 }
 0x23b   : > { %3289 = vmatprep.mubr.msk.bf16.mxu1 %vm518_vm0, %v989_v43  ;;  %v1026_v57 = vpop.permute.xlu1 %1025 }
 0x23c   : > { %v1076_v42 = vsel %vm518_vm0, %v949_v32, %v1026_v57 }
 0x23d   : > { %1504 = vmatmul.mubr.bf16.gmra.mrb[20].mxu0 %v1068_v17 }
 0x23e   : > { %1511 = vmatprep.mubr.bf16.mxu0 %v1085_v14 }
 0x242   : > { %3290 = vmatmul.mubr.msk.bf16.gmra.mrb[28].mxu1 %vm518_vm0, %v990_v9 }
 0x245   : > { %1512 = vmatmul.mubr.bf16.gmra.mrb[24].mxu0 %v1072_v10 }
 0x246   : > { %1519 = vmatprep.mubr.bf16.mxu0 %v1089_v59 }
 0x24d   : > { %1520 = vmatmul.mubr.bf16.gmra.mrb[28].mxu0 %v1076_v42 }
 0x2e1   : > { %v3089_v11 = vpop.f32.mrb[8].mxu1 }
 0x2e2   : > { %v3090_v19 = vpop.f32.mrb[9].mxu1 }
 0x2e3   : > { %v3091_v41 = vadd.f32 %v3090_v19, %v3089_v11  ;;  %v3092_v52 = vpop.f32.mrb[10].mxu1 }
 0x2e4   : > { %v3093_v40 = vpop.f32.mrb[11].mxu1 }
 0x2e5   : > { %v3094_v12 = vadd.f32 %v3093_v40, %v3092_v52  ;;  %v1433_v54 = vadd.f32 %v3091_v41, %v4232_v44 }
 0x2e7   : > { %v1436_v4 = vadd.f32 %v3094_v12, %v4232_v44 }
 0x2f0   : > { %v3095_v25 = vpop.f32.mrb[12].mxu1 }
 0x2f1   : > { %v3096_v13 = vpop.f32.mrb[13].mxu1 }
 0x2f2   : > { %v3097_v33 = vadd.f32 %v3096_v13, %v3095_v25  ;;  %v3098_v34 = vpop.f32.mrb[14].mxu1 }
 0x2f3   : > { %v3099_v20 = vpop.f32.mrb[15].mxu1 }
 0x2f4   : > { %v3100_v58 = vadd.f32 %v3099_v20, %v3098_v34  ;;  %v1441_v13 = vadd.f32 %v3097_v33, %v4232_v44 }
 0x2fd   : > { %v3101_v35 = vpop.f32.mrb[16].mxu1 }
 0x2fe   : > { %v3102_v46 = vpop.f32.mrb[17].mxu1 }
 0x2ff   : > { %v3103_v36 = vadd.f32 %v3102_v46, %v3101_v35  ;;  %v3104_v48 = vpop.f32.mrb[18].mxu1  ;;  %v1444_v35 = vadd.f32 %v3100_v58, %v4232_v44 }
 0x300   : > { %v3105_v28 = vpop.f32.mrb[19].mxu1 }
 0x301   : > { %v3106_v2 = vadd.f32 %v3105_v28, %v3104_v48 }
 0x305   : > { %v3107_v43 = vpop.f32.mrb[20].mxu1 }
 0x306   : > { %v3108_v63 = vpop.f32.mrb[21].mxu1 }
 0x307   : > { %v3109_v38 = vadd.f32 %v3108_v63, %v3107_v43  ;;  %v3110_v3 = vpop.f32.mrb[22].mxu1 }
 0x308   : > { %v3111_v17 = vpop.f32.mrb[23].mxu1  ;;  %v3129_v31 = vpop.f32.mrb[16].mxu0 }
 0x309   : > { %v4234_v53 = vadd.f32 %v3111_v17, %v3110_v3  ;;  %v3130_v14 = vpop.f32.mrb[17].mxu0 }
 0x30a   : > { %v3131_v47 = vadd.f32 %v3130_v14, %v3129_v31  ;;  %v3132_v9 = vpop.f32.mrb[18].mxu0 }
 0x30b   : > { %v3133_v60 = vpop.f32.mrb[19].mxu0 }
 0x30c   : > { %v3134_v18 = vadd.f32 %v3133_v60, %v3132_v9  ;;  %v1498_v8 = vadd.f32 %v3131_v47, %v1433_v54  ;;  %v1449_v60 = vadd.f32 %v3103_v36, %v4232_v44 }
 0x30d   : > { %v3287_v10 = vpop.f32.mrb[24].mxu1 }
 0x30e   : > { %v1562_v59 = vpop.f32.mrb[25].mxu1  ;;  %v1501_v57 = vadd.f32 %v3134_v18, %v1436_v4 }
 0x30f   : > { %v1563_v32 = vadd.f32 %v1562_v59, %v1498_v8  ;;  %v3288_v42 = vpop.f32.mrb[26].mxu1  ;;  %v1452_v59 = vadd.f32 %v3106_v2, %v4232_v44 }
 0x310   : > { %v3135_v11 = vpop.f32.mrb[20].mxu0  ;;  %v1565_v19 = vpop.f32.mrb[27].mxu1 }
 0x311   : > { %v1593_v52 = vmax.f32 %v1563_v32, 0.0  ;;  %v1566_v40 = vadd.f32 %v1565_v19, %v1501_v57  ;;  %v3136_v25 = vpop.f32.mrb[21].mxu0 }
 0x312   : > { %v3137_v41 = vadd.f32 %v3136_v25, %v3135_v11  ;;  %v3138_v34 = vpop.f32.mrb[22].mxu0  ;;  %v1457_v25 = vadd.f32 %v3109_v38, %v4232_v44 }
 0x313   : > { %v1594_v20 = vmax.f32 %v1566_v40, 0.0  ;;  %1609 = vrot.lane.b32.xlu0 %v1593_v52, %s4925_s22  ;;  %v3139_v12 = vpop.f32.mrb[23].mxu0 }
 0x314   : > { %v1506_v46 = vadd.f32 %v3137_v41, %v1441_v13  ;;  %v3140_v48 = vadd.f32 %v3139_v12, %v3138_v34 }
 0x315   : > { %v4241_v28 = vpack.c.bf16 %v1594_v20, %v1593_v52  ;;  %v3291_v43 = vpop.f32.mrb[28].mxu1  ;;  %1611 = vrot.lane.b32.xlu1 %v1594_v20, %s4925_s22  ;;  %v1460_v20 = vadd.f32 %v4234_v53, %v4232_v44  ;;  %v3440_v44 = vld [vmem:[%s4902_s7 + $0x40] sm:$0xff]  }
 0x316   : > { %v1509_v63 = vadd.f32 %v3140_v48, %v1444_v35  ;;  %v1578_v3 = vpop.f32.mrb[29].mxu1  ;;  %v1571_v17 = vadd.f32 %v3287_v10, %v1506_v46  ;;  %v3441_v53 = vld [vmem:[%s4902_s7] sm:$0xff]   ;;  %3161 = vmatprep.subr.bf16.mxu0 %v3440_v44  ;;  %v3464_v44 = vld [vmem:[%s4902_s7 + $0x98] sm:$0xff]  }
 0x317   : > { %v3292_v31 = vpop.f32.mrb[30].mxu1  ;;  %3162 = vmatpush3.bf16.msra.mxu0 %v3441_v53  ;;  %v3466_v53 = vld [vmem:[%s4902_s7 + $0xe0] sm:$0xff]  }
 0x318   : > { %v3141_v33 = vpop.f32.mrb[24].mxu0  ;;  %v1581_v14 = vpop.f32.mrb[31].mxu1  ;;  %v1595_v54 = vmax.f32 %v1571_v17, 0.0  ;;  %v1574_v47 = vadd.f32 %v3288_v42, %v1509_v63 }
 0x319   : > { %v3142_v9 = vpop.f32.mrb[25].mxu0 }
 0x31a   : > { %v3143_v4 = vadd.f32 %v3142_v9, %v3141_v33  ;;  %v3144_v58 = vpop.f32.mrb[26].mxu0  ;;  %1613 = vrot.lane.b32.xlu0 %v1595_v54, %s4925_s22  ;;  %v1596_v18 = vmax.f32 %v1574_v47, 0.0  ;;  %v3446_v47 = vld [vmem:[%s4902_s7 + $0x58] sm:$0xff]  }
 0x31b   : > { %v3145_v8 = vpop.f32.mrb[27].mxu0  ;;  %v3447_v9 = vld [vmem:[%s4902_s7 + $0x18] sm:$0xff]  }
 0x31c   : > { %v1514_v57 = vadd.f32 %v3143_v4, %v1449_v60  ;;  %v3146_v32 = vadd.f32 %v3145_v8, %v3144_v58  ;;  %1615 = vrot.lane.b32.xlu1 %v1596_v18, %s4925_s22  ;;  %v4248_v10 = vpack.c.bf16 %v1596_v18, %v1595_v54  ;;  %v3445_v54 = vld [vmem:[%s4902_s7 + $0x10] sm:$0xff]   ;;  %v3448_v60 = vld [vmem:[%s4902_s7 + $0x60] sm:$0xff]   ;;  %v3450_v58 = vld [vmem:[%s4902_s7 + $0x68] sm:$0xff]  }
 0x31d   : > { %v3449_v4 = vld [vmem:[%s4902_s7 + $0x20] sm:$0xff]   ;;  %v3451_v18 = vld [vmem:[%s4902_s7 + $0x28] sm:$0xff]   ;;  %v3452_v8 = vld [vmem:[%s4902_s7 + $0x70] sm:$0xff]  }
 0x31e   : > { %v1517_v11 = vadd.f32 %v3146_v32, %v1452_v59  ;;  %v1579_v19 = vadd.f32 %v1578_v3, %v1514_v57  ;;  %v3453_v59 = vld [vmem:[%s4902_s7 + $0x30] sm:$0xff]   ;;  %v3454_v57 = vld [vmem:[%s4902_s7 + $0xc0] sm:$0xff]   ;;  %v3455_v32 = vld [vmem:[%s4902_s7 + $0x78] sm:$0xff]  }
 0x31f   : > { %3201 = vmatprep.subr.bf16.mxu1 %v3454_v57 }
 0x320   : > { %v3147_v42 = vpop.f32.mrb[28].mxu0  ;;  %v1597_v52 = vmax.f32 %v1579_v19, 0.0  ;;  %v1582_v40 = vadd.f32 %v1581_v14, %v1517_v11  ;;  %v3444_v14 = vld [vmem:[%s4902_s7 + $0x50] sm:$0xff]   ;;  %v3456_v11 = vld [vmem:[%s4902_s7 + $0x80] sm:$0xff]   ;;  %v3457_v19 = vld [vmem:[%s4902_s7 + $0x38] sm:$0xff]  }
 0x321   : > { %v3148_v36 = vpop.f32.mrb[29].mxu0  ;;  %3202 = vmatpush3.bf16.msra.mxu1 %v3456_v11 }
 0x322   : > { %v3149_v13 = vadd.f32 %v3148_v36, %v3147_v42  ;;  %1617 = vrot.lane.b32.xlu0 %v1597_v52, %s4925_s22  ;;  %v3150_v41 = vpop.f32.mrb[30].mxu0  ;;  %v1598_v34 = vmax.f32 %v1582_v40, 0.0  ;;  %v3459_v36 = vld [vmem:[%s4902_s7 + $0x88] sm:$0xff]  }
 0x323   : > { %v3151_v2 = vpop.f32.mrb[31].mxu0 }
 0x324   : > { %v1522_v12 = vadd.f32 %v3149_v13, %v1457_v25  ;;  %v3152_v35 = vadd.f32 %v3151_v2, %v3150_v41  ;;  %1619 = vrot.lane.b32.xlu1 %v1598_v34, %s4925_s22  ;;  %v4255_v46 = vpack.c.bf16 %v1598_v34, %v1597_v52  ;;  %v3458_v52 = vld [vmem:[%s4902_s7 + $0xc8] sm:$0xff]   ;;  %v4326_v25 = vld [vmem:[%s4902_s7 + $0x100] sm:$0xff]   ;;  %v3461_v13 = vld [vmem:[%s4902_s7 + $0xd0] sm:$0xff]  }
 0x325   : > { %3203 = vmatprep.subr.bf16.mxu1 %v3458_v52  ;;  %v3462_v41 = vld [vmem:[%s4902_s7 + $0x90] sm:$0xff]  }
 0x326   : > { %v1525_v48 = vadd.f32 %v3152_v35, %v1460_v20  ;;  %v1587_v63 = vadd.f32 %v3291_v43, %v1522_v12  ;;  %v3442_v43 = vld [vmem:[%s4902_s7 + $0x48] sm:$0xff]   ;;  %3204 = vmatpush3.bf16.msra.mxu1 %v3459_v36 }
 0x327   : > { %3163 = vmatprep.subr.bf16.mxu0 %v3442_v43  ;;  %3205 = vmatprep.subr.bf16.mxu1 %v3461_v13 }
 0x328   : > { %v1599_v3 = vmax.f32 %v1587_v63, 0.0  ;;  %v1590_v17 = vadd.f32 %v3292_v31, %v1525_v48  ;;  %v3443_v31 = vld [vmem:[%s4902_s7 + $0x8] sm:$0xff]  }
 0x329   : > { %3164 = vmatpush3.bf16.msra.mxu0 %v3443_v31 }
 0x32a   : > { %1621 = vrot.lane.b32.xlu0 %v1599_v3, %s4925_s22  ;;  %v1600_v38 = vmax.f32 %v1590_v17, 0.0  ;;  %3165 = vmatprep.subr.bf16.mxu0 %v3444_v14 }
 0x32b   : > { %3206 = vmatpush3.bf16.msra.mxu1 %v3462_v41 }
 0x32c   : > { %1623 = vrot.lane.b32.xlu1 %v1600_v38, %s4925_s22  ;;  %v4259_v33 = vpack.c.bf16 %v1600_v38, %v1599_v3 }
 0x32d   : > { %3166 = vmatpush3.bf16.msra.mxu0 %v3445_v54 }
 0x32e   : > { %3167 = vmatprep.subr.bf16.mxu0 %v3446_v47  ;;  %v3467_v47 = vld [vmem:[%s4902_s7 + $0xa0] sm:$0xff]  }
 0x331   : > { %3168 = vmatpush3.bf16.msra.mxu0 %v3447_v9 }
 0x332   : > { %3169 = vmatprep.subr.bf16.mxu0 %v3448_v60 }
 0x335   : > { %3170 = vmatpush3.bf16.msra.mxu0 %v3449_v4 }
 0x336   : > { %3171 = vmatprep.subr.bf16.mxu0 %v3450_v58 }
 0x339   : > { %3172 = vmatpush3.bf16.msra.mxu0 %v3451_v18 }
 0x33a   : > { %3173 = vmatprep.subr.bf16.mxu0 %v3452_v8 }
 0x33d   : > { %3174 = vmatpush3.bf16.msra.mxu0 %v3453_v59 }
 0x33e   : > { %3175 = vmatprep.subr.bf16.mxu0 %v3455_v32 }
 0x341   : > { %3176 = vmatpush3.bf16.msra.mxu0 %v3457_v19 }
 0x342   : > { %3293 = vmatprep.subr.bf16.mxu0 %v4326_v25 }
 0x385   : > { %v1610_v42 = vpop.permute.xlu0 %1609 }
 0x386   : > { %1633 = vst.msk [vmem:[#allocation2 + $0x10] sm:$0xff] %vm518_vm0, %v1610_v42 }
 0x387   : > { %v1612_v40 = vpop.permute.xlu1 %1611 }
 0x388   : > { %1634 = vst.msk [vmem:[#allocation2 + $0x18] sm:$0xff] %vm518_vm0, %v1612_v40 }
 0x38c   : > { %v1614_v34 = vpop.permute.xlu0 %1613 }
 0x38d   : > { %1635 = vst.msk [vmem:[#allocation2 + $0x20] sm:$0xff] %vm518_vm0, %v1614_v34  ;;  %v4336_v2 = vld [vmem:[#allocation2 + $0x10] sm:$0xff]  ;;  %v3469_v34 = vld [vmem:[%s4902_s7 + $0xa8] sm:$0xff]  }
 0x38e   : > { %v4338_v20 = vld [vmem:[#allocation2 + $0xf] sm:$0xff]  ;;  %v1616_v12 = vpop.permute.xlu1 %1615  ;;  %v1669_v35 = vpack.c.bf16 %v4336_v2, %v3934_v30  ;;  %v3463_v30 = vld [vmem:[%s4902_s7 + $0xd8] sm:$0xff]  }
 0x38f   : > { %1636 = vst.msk [vmem:[#allocation2 + $0x28] sm:$0xff] %vm518_vm0, %v1616_v12  ;;  %v1643_v48 = vld [vmem:[#allocation2 + $0x17] sm:$0xff]  ;;  %v1694_v3 = vmul.f32 %v4338_v20, %v3916_v21  ;;  %3207 = vmatprep.subr.bf16.mxu1 %v3463_v30 }
 0x390   : > { %v4343_v63 = vld [vmem:[#allocation2 + $0x18] sm:$0xff]  ;;  %1756 = vrot.lane.b32.xlu1 %v1669_v35, %s4924_s12  ;;  %v1695_v17 = vmul.f32 %v1643_v48, %v3931_v29  ;;  %3208 = vmatpush3.bf16.msra.mxu1 %v3464_v44  ;;  %v4379_v57 = vmul.f32 %v1643_v48, %v3916_v21  ;;  %v4382_v32 = vmul.f32 %v1643_v48, %v3992_v55  ;;  %v3468_v21 = vld [vmem:[%s4902_s7 + $0xe8] sm:$0xff]   ;;  %v3471_v35 = vld [vmem:[%s4902_s7 + $0xf0] sm:$0xff]  }
 0x391   : > { %3209 = vmatprep.subr.bf16.mxu1 %v3466_v53  ;;  %v3472_v30 = vld [vmem:[%s4902_s7 + $0xb0] sm:$0xff]  }
 0x392   : > { %v1702_v43 = vpack.c.bf16 %v1695_v17, %v1694_v3  ;;  %v1674_v51 = vld [vmem:[#allocation2 + $0x11] sm:$0xff] }
 0x394   : > { %1768 = vrot.lane.b32.xlu0 %v1702_v43, %s4924_s12  ;;  %v1618_v31 = vpop.permute.xlu0 %1617  ;;  %v4361_v14 = vld [vmem:[#allocation2 + $0x20] sm:$0xff]  ;;  %3210 = vmatpush3.bf16.msra.mxu1 %v3467_v47 }
 0x395   : > { %v1644_v54 = vld [vmem:[#allocation2 + $0x1f] sm:$0xff]  ;;  %1637 = vst.msk [vmem:[#allocation2 + $0x30] sm:$0xff] %vm518_vm0, %v1618_v31  ;;  %v1670_v9 = vpack.c.bf16 %v4361_v14, %v4343_v63  ;;  %3211 = vmatprep.subr.bf16.mxu1 %v3468_v21 }
 0x396   : > { %v4369_v60 = vld [vmem:[#allocation2 + $0x19] sm:$0xff]  ;;  %v4372_v4 = vmul.f32 %v1644_v54, %v3931_v29  ;;  %v1620_v58 = vpop.permute.xlu1 %1619  ;;  %v1645_v18 = vld [vmem:[#allocation2 + $0x27] sm:$0xff]  ;;  %v4385_v11 = vmul.f32 %v1644_v54, %v3994_v56  ;;  %v1696_v19 = vmul.f32 %v1644_v54, %v3992_v55 }
 0x397   : > { %v4374_v8 = vld [vmem:[#allocation2 + $0x28] sm:$0xff]  ;;  %1638 = vst.msk [vmem:[#allocation2 + $0x38] sm:$0xff] %vm518_vm0, %v1620_v58  ;;  %1758 = vrot.lane.b32.xlu1 %v1670_v9, %s4924_s12  ;;  %v1697_v42 = vmul.f32 %v1645_v18, %v3994_v56  ;;  %v4400_v36 = vmul.f32 %v4369_v60, %v4080_v49  ;;  %v4416_v48 = vmul.f32 %v4369_v60, %v4056_v26 }
 0x398   : > { %v4376_v59 = vld [vmem:[#allocation2 + $0x21] sm:$0xff]  ;;  %3212 = vmatpush3.bf16.msra.mxu1 %v3469_v34  ;;  %v4440_v21 = vmul.f32 %v1645_v18, %v4019_v6  ;;  %v4446_v34 = vmul.f32 %v1645_v18, %v3992_v55  ;;  %v3473_v55 = vld [vmem:[%s4902_s7 + $0xf8] sm:$0xff]  }
 0x399   : > { %v4404_v13 = vmul.f32 %v4376_v59, %v4082_v50  ;;  %v1703_v12 = vpack.c.bf16 %v1697_v42, %v1696_v19  ;;  %v4420_v3 = vmul.f32 %v4376_v59, %v4058_v27  ;;  %3213 = vmatprep.subr.bf16.mxu1 %v3471_v35 }
 0x39b   : > { %1770 = vrot.lane.b32.xlu0 %v1703_v12, %s4924_s12 }
 0x39c   : > { %v1622_v53 = vpop.permute.xlu0 %1621  ;;  %v4430_v43 = vld [vmem:[#allocation2 + $0x30] sm:$0xff]  ;;  %3214 = vmatpush3.bf16.msra.mxu1 %v3472_v30 }
 0x39d   : > { %4926 = vst [vmem:[#allocation11_spill] sm:$0xff] %v4430_v43  ;;  %v1646_v31 = vld [vmem:[#allocation2 + $0x2f] sm:$0xff]  ;;  %1639 = vst.msk [vmem:[#allocation2 + $0x40] sm:$0xff] %vm518_vm0, %v1622_v53  ;;  %v1671_v47 = vpack.c.bf16 %v4430_v43, %v4374_v8  ;;  %3215 = vmatprep.subr.bf16.mxu1 %v3473_v55  ;;  %v1714_v55 = vmul.f32 %v4376_v59, %v4080_v49 }
 0x39e   : > { %v1677_v54 = vld [vmem:[#allocation2 + $0x29] sm:$0xff]  ;;  %v1624_v9 = vpop.permute.xlu1 %1623  ;;  %v1647_v58 = vld [vmem:[#allocation2 + $0x37] sm:$0xff]  ;;  %v4443_v12 = vmul.f32 %v1646_v31, %v4021_v7  ;;  %v4449_v53 = vmul.f32 %v1646_v31, %v3994_v56  ;;  %v1698_v35 = vmul.f32 %v1646_v31, %v4019_v6 }
 0x39f   : > { %v4435_v19 = vld [vmem:[#allocation2 + $0x38] sm:$0xff]  ;;  %1640 = vst.msk [vmem:[#allocation2 + $0x48] sm:$0xff] %vm518_vm0, %v1624_v9  ;;  %1760 = vrot.lane.b32.xlu1 %v1671_v47, %s4924_s12  ;;  %v1699_v5 = vmul.f32 %v1647_v58, %v4021_v7  ;;  %v4458_v44 = vmul.f32 %v1677_v54, %v4080_v49  ;;  %v4468_v18 = vmul.f32 %v1677_v54, %v4095_v0 }
 0x3a0   : > { %v4437_v42 = vld [vmem:[#allocation2 + $0x31] sm:$0xff]  ;;  %v1715_v30 = vmul.f32 %v1677_v54, %v4082_v50 }
 0x3a1   : > { %v4465_v56 = vmul.f32 %v4437_v42, %v4082_v50  ;;  %v4472_v31 = vmul.f32 %v4437_v42, %v4097_v1  ;;  %v3474_v9 = vld [vmem:[%s4902_s7 + $0xb8] sm:$0xff]   ;;  %v1704_v52 = vpack.c.bf16 %v1699_v5, %v1698_v35 }
 0x3a2   : > { %3216 = vmatpush3.bf16.msra.mxu1 %v3474_v9  ;;  %v4512_v9 = vmul.f32 %v1647_v58, %v4049_v22 }
 0x3a3   : > { %1772 = vrot.lane.b32.xlu0 %v1704_v52, %s4924_s12  ;;  %v1713_v52 = vmul.f32 %v4369_v60, %v4058_v27  ;;  %v1721_v60 = vpack.c.bf16 %v1715_v30, %v1714_v55 }
 0x3a4   : > { %v4486_v40 = vld [vmem:[#allocation2 + $0x40] sm:$0xff] }
 0x3a5   : > { %4927 = vst [vmem:[#allocation12_spill] sm:$0xff] %v4486_v40  ;;  %v1648_v47 = vld [vmem:[#allocation2 + $0x3f] sm:$0xff]  ;;  %v1672_v5 = vpack.c.bf16 %v4486_v40, %v4435_v19 }
 0x3a6   : > { %v1679_v35 = vld [vmem:[#allocation2 + $0x39] sm:$0xff]  ;;  %v4493_v38 = vld [vmem:[#allocation2 + $0x47] sm:$0xff]  ;;  %v4500_v61 = vmul.f32 %v1648_v47, %v4051_v24  ;;  %v4503_v50 = vmul.f32 %v1648_v47, %v4021_v7  ;;  %v1700_v54 = vmul.f32 %v1648_v47, %v4049_v22 }
 0x3a7   : > { %v4495_v41 = vld [vmem:[#allocation2 + $0x48] sm:$0xff]  ;;  %1762 = vrot.lane.b32.xlu1 %v1672_v5, %s4924_s12  ;;  %v1701_v49 = vmul.f32 %v4493_v38, %v4051_v24  ;;  %v4515_v39 = vmul.f32 %v1679_v35, %v4111_v15  ;;  %v4518_v7 = vmul.f32 %v1679_v35, %v4095_v0  ;;  %v4521_v5 = vmul.f32 %v1647_v58, %v4019_v6 }
 0x3a8   : > { %v1680_v17 = vld [vmem:[#allocation2 + $0x41] sm:$0xff]  ;;  %v1712_v6 = vmul.f32 %v1674_v51, %v4056_v26  ;;  %v1717_v59 = vmul.f32 %v1679_v35, %v4097_v1  ;;  %v4543_v43 = vld [vmem:[#allocation2 + $0x49] sm:$0xff] }
 0x3a9   : > { %v1705_v47 = vpack.c.bf16 %v1701_v49, %v1700_v54  ;;  %v4524_v23 = vmul.f32 %v1680_v17, %v4113_v16  ;;  %v4529_v40 = vmul.f32 %v1680_v17, %v4097_v1  ;;  %v1735_v30 = vpack.c.bf16 %v4503_v50, %v4521_v5 }
 0x3aa   : > { %v1738_v54 = vpack.c.bf16 %v4091_v62, %v4495_v41  ;;  %v1720_v49 = vpack.c.bf16 %v1713_v52, %v1712_v6  ;;  %v1682_v1 = vmul.f32 %v1674_v51, %v4058_v27  ;;  %v3470_v27 = vld [vmem:[%s4902_s7 + $0x110] sm:$0xff]  }
 0x3ab   : > { %1782 = vrot.lane.b32.xlu1 %v1721_v60, %s4924_s12  ;;  %1774 = vrot.lane.b32.xlu0 %v1705_v47, %s4924_s12  ;;  %v1692_v58 = vpack.c.bf16 %v4524_v23, %v4515_v39  ;;  %v1750_v55 = vpack.c.bf16 %v4529_v40, %v4518_v7  ;;  %v1716_v60 = vmul.f32 %v4437_v42, %v4095_v0  ;;  %v1673_v0 = vld [vmem:[#allocation2 + $0x9] sm:$0xff] }
 0x3ac   : > { %v1718_v23 = vmul.f32 %v1680_v17, %v4111_v15  ;;  %v1719_v39 = vmul.f32 %v4543_v43, %v4113_v16  ;;  %v1650_v16 = vmul.f32 %v4338_v20, %v3931_v29  ;;  %v1681_v17 = vmul.f32 %v1673_v0, %v4056_v26  ;;  %v3486_v0 = vld [vmem:[%s4904_s9 + $0x20] ss:$12 sps:$4 sm:$0xff]  }
 0x3ad   : > { %v1722_v47 = vpack.c.bf16 %v1717_v59, %v1716_v60  ;;  %v4928_v29 = vpack.c.bf16 %v4372_v4, %v4379_v57  ;;  %v4929_v20 = vpack.c.bf16 %v4404_v13, %v4400_v36  ;;  %v4930_v4 = vpack.c.bf16 %v4385_v11, %v4382_v32 }
 0x3ae   : > { %v1723_v62 = vpack.c.bf16 %v1719_v39, %v1718_v23  ;;  %v1689_v42 = vpack.c.bf16 %v1682_v1, %v1681_v17  ;;  %v1657_v35 = vpack.c.bf16 %v1650_v16, %v4129_v45  ;;  %v4931_v36 = vpack.c.bf16 %v4472_v31, %v4468_v18  ;;  %v3479_v1 = vld [vmem:[%s4904_s9 + $0x18] ss:$12 sps:$4 sm:$0xff]   ;;  %v3485_v16 = vld [vmem:[%s4904_s9 + $0x34] ss:$12 sps:$4 sm:$0xff]  }
 0x3af   : > { %1789 = vrot.lane.b32.xlu1 %v1738_v54, %s4924_s12  ;;  %1780 = vrot.lane.b32.xlu0 %v1720_v49, %s4924_s12  ;;  %v4932_v49 = vpack.c.bf16 %v4443_v12, %v4440_v21  ;;  %v4933_v23 = vpack.c.bf16 %v4500_v61, %v4512_v9  ;;  %v4934_v39 = vpack.c.bf16 %v4343_v63, %v4336_v2  ;;  %v3490_v17 = vld [vmem:[%s4904_s9 + $0x38] ss:$12 sps:$4 sm:$0xff]  }
 0x3b0   : > { %v4935_v12 = vpack.c.bf16 %v4420_v3, %v4416_v48  ;;  %v4938_v2 = vpack.c.bf16 %v4374_v8, %v4361_v14  ;;  %v1724_v48 = vld [vmem:[#allocation2 + $0x4f] sm:$0xff]  ;;  %v1746_v3 = vmul.f32 %v4543_v43, %v4111_v15  ;;  %v1731_v40 = vmul.f32 %v4493_v38, %v4049_v22  ;;  %v4939_v15 = vld [vmem:[#allocation11_spill] sm:$0xff] }
 0x3b1   : > { %v4940_v43 = vpack.c.bf16 %v4435_v19, %v4939_v15  ;;  %v4941_v22 = vld [vmem:[#allocation12_spill] sm:$0xff]  ;;  %v3478_v19 = vld [vmem:[%s4904_s9 + $0x4] ss:$12 sps:$4 sm:$0xff]  }
 0x3b2   : > { %v1751_v14 = vpack.c.bf16 %v4214_v37, %v1746_v3  ;;  %v4943_v37 = vmov 0   ;;  %2600 = vmatprep.subr.bf16.mxu1 %v3478_v19 }
 0x3b3   : > { %2378 = vrot.lane.b32.xlu1 %v4241_v28, %s3600_s16  ;;  %1784 = vrot.lane.b32.xlu0 %v1722_v47, %s4924_s12 }
 0x3b7   : > { %2380 = vrot.lane.b32.xlu1 %v4248_v10, %s3600_s16  ;;  %1786 = vrot.lane.b32.xlu0 %v1723_v62, %s4924_s12  ;;  %v4937_v62 = vpack.c.bf16 %v4465_v56, %v4458_v44 }
 0x3bb   : > { %2382 = vrot.lane.b32.xlu1 %v4255_v46, %s3600_s16  ;;  %v3465_v46 = vld [vmem:[%s4902_s7 + $0x108] sm:$0xff]  }
 0x3bf   : > { %2384 = vrot.lane.b32.xlu1 %v4259_v33, %s3600_s16  ;;  %s4769_s16 = scalar_lea.vmem [#allocation3], %s3333_s15 }
 0x3c0   : > { %s2824_s0 = sshll.u32 %s4769_s16, 4  ;;  %s4840_s0 = int_to_ptr.vmem [resolvable:$true] %s2824_s0 }
 0x3c1   : > { %s3532_s26 = scalar_lea.vmem %s4840_s0, 3072 }
 0x3c2   : > { %p3533_p11 = scmp.ne.s32.totalorder %s4840_s0, %s3532_s26 }
 0x3c4   : > { %p3534_p12 = pnand %p3533_p11, %p3702_p5 }
 0x3c6   : > { %p3535_p13 = pneg %p3534_p12 }
 0x402   : > { %v1757_v28 = vpop.permute.xlu1 %1756 }
 0x403   : > { %v1793_v33 = vsel %vm518_vm0, %v1657_v35, %v1757_v28  ;;  %v3483_v28 = vld [vmem:[%s4904_s9 + $0x30] ss:$12 sps:$4 sm:$0xff]  }
 0x404   : > { %v3494_v35 = vld [vmem:[%s4904_s9 + $0x50] ss:$12 sps:$4 sm:$0xff]  }
 0x406   : > { %v1769_v52 = vpop.permute.xlu0 %1768 }
 0x407   : > { %v1809_v10 = vsel %vm518_vm0, %v1689_v42, %v1769_v52  ;;  %v3489_v42 = vld [vmem:[%s4904_s9 + $0x4c] ss:$12 sps:$4 sm:$0xff]   ;;  %v3487_v52 = vld [vmem:[%s4904_s9 + $0x48] ss:$12 sps:$4 sm:$0xff]  }
 0x408   : > { %2191 = vmatprep.mubr.bf16.mxu0 %v1809_v10  ;;  %v3493_v10 = vld [vmem:[%s4904_s9 + $0x64] ss:$12 sps:$4 sm:$0xff]  }
 0x409   : > { %v1759_v51 = vpop.permute.xlu1 %1758  ;;  %2192 = vmatmul.mubr.bf16.vlgmr.msra.gmra.mrb[32].mxu0 %v1793_v33  ;;  %v3491_v33 = vld [vmem:[%s4904_s9 + $0x60] ss:$12 sps:$4 sm:$0xff]  }
 0x40a   : > { %3294 = vmatpush3.bf16.msra.mxu0 %v4326_v25  ;;  %v1840_v26 = vsel %vm518_vm0, %v4928_v29, %v1759_v51  ;;  %v3475_v25 = vld [vmem:[%s4902_s7 + $0x118] sm:$0xff]   ;;  %v1797_v57 = vsel %vm518_vm0, %v4930_v4, %v1759_v51  ;;  %v3502_v29 = vld [vmem:[%s4904_s9 + $0x80] ss:$12 sps:$4 sm:$0xff]  }
 0x40b   : > { %2256 = vmatprep.mubr.bf16.mxu1 %v1840_v26  ;;  %3295 = vmatprep.subr.bf16.mxu0 %v3465_v46  ;;  %v3497_v51 = vld [vmem:[%s4904_s9 + $0x7c] ss:$12 sps:$4 sm:$0xff]   ;;  %v3495_v26 = vld [vmem:[%s4904_s9 + $0x78] ss:$12 sps:$4 sm:$0xff]  }
 0x40d   : > { %v1771_v45 = vpop.permute.xlu0 %1770 }
 0x40e   : > { %v1813_v59 = vsel %vm518_vm0, %v4929_v20, %v1771_v45  ;;  %3296 = vmatpush3.bf16.msra.mxu0 %v3465_v46  ;;  %v3498_v46 = vld [vmem:[%s4904_s9 + $0x68] ss:$12 sps:$4 sm:$0xff]   ;;  %v3506_v45 = vld [vmem:[%s4904_s9 + $0x98] ss:$12 sps:$4 sm:$0xff]   ;;  %v3499_v20 = vld [vmem:[%s4904_s9 + $0x90] ss:$12 sps:$4 sm:$0xff]  }
 0x40f   : > { %2199 = vmatprep.mubr.bf16.mxu0 %v1813_v59  ;;  %3297 = vmatprep.subr.bf16.mxu0 %v3470_v27  ;;  %v3505_v59 = vld [vmem:[%s4904_s9 + $0xac] ss:$12 sps:$4 sm:$0xff]  }
 0x411   : > { %2200 = vmatmul.mubr.bf16.gmra.mrb[36].mxu0 %v1797_v57  ;;  %v1761_v6 = vpop.permute.xlu1 %1760 }
 0x412   : > { %3298 = vmatpush3.bf16.msra.mxu0 %v3470_v27  ;;  %v1801_v60 = vsel %vm518_vm0, %v4932_v49, %v1761_v6  ;;  %v3501_v27 = vld [vmem:[%s4904_s9 + $0x94] ss:$12 sps:$4 sm:$0xff]  }
 0x413   : > { %3299 = vmatprep.subr.bf16.mxu0 %v3475_v25 }
 0x415   : > { %v1773_v54 = vpop.permute.xlu0 %1772 }
 0x416   : > { %v1817_v13 = vsel %vm518_vm0, %v4931_v36, %v1773_v54  ;;  %3300 = vmatpush3.bf16.msra.mxu0 %v3475_v25  ;;  %v3503_v25 = vld [vmem:[%s4904_s9 + $0xa8] ss:$12 sps:$4 sm:$0xff]  }
 0x417   : > { %2207 = vmatprep.mubr.bf16.mxu0 %v1817_v13 }
 0x419   : > { %2208 = vmatmul.mubr.bf16.gmra.mrb[40].mxu0 %v1801_v60  ;;  %v1763_v32 = vpop.permute.xlu1 %1762 }
 0x41a   : > { %v1805_v18 = vsel %vm518_vm0, %v4933_v23, %v1763_v32  ;;  %v1846_v44 = vsel %vm518_vm0, %v1735_v30, %v1763_v32  ;;  %v3476_v30 = vld [vmem:[%s4904_s9] ss:$12 sps:$4 sm:$0xff]  }
 0x41d   : > { %v1775_v11 = vpop.permute.xlu0 %1774  ;;  %v1783_v9 = vpop.permute.xlu1 %1782 }
 0x41e   : > { %v1821_v47 = vsel %vm518_vm0, %v1692_v58, %v1775_v11  ;;  %v4936_v58 = vpack.c.bf16 %v4449_v53, %v4446_v34  ;;  %v1829_v63 = vsel %vm518_vm0, %v4938_v2, %v1783_v9  ;;  %v1732_v34 = vmul.f32 %v1724_v48, %v4051_v24  ;;  %v4717_v9 = vld [vmem:[%s4903_s8] ss:$0 sm:$0xff] }
 0x41f   : > { %2215 = vmatprep.mubr.bf16.mxu0 %v1821_v47  ;;  %v4942_v24 = vpack.c.bf16 %v4495_v41, %v4941_v22  ;;  %v3482_v41 = vld [vmem:[%s4904_s9 + $0x8] ss:$12 sps:$4 sm:$0xff]  }
 0x420   : > { %v1843_v61 = vsel %vm518_vm0, %v4936_v58, %v1761_v6  ;;  %v1736_v56 = vpack.c.bf16 %v1732_v34, %v1731_v40  ;;  %3309 = vmatprep.subr.bf16.mxu0 %v3482_v41 }
 0x421   : > { %2216 = vmatmul.mubr.bf16.gmra.mrb[44].mxu0 %v1805_v18  ;;  %v1781_v31 = vpop.permute.xlu0 %1780  ;;  %v1790_v8 = vpop.permute.xlu1 %1789 }
 0x422   : > { %v1825_v21 = vsel %vm518_vm0, %v4934_v39, %v1781_v31  ;;  %3301 = vmatprep.mubr.msk.bf16.mxu0 %vm518_vm0, %v4935_v12  ;;  %v1850_v7 = vsel %vm518_vm0, %v1736_v56, %v1790_v8 }
 0x423   : > { %2257 = vmatmul.mubr.bf16.vlgmr.msra.gmra.mrb[32].mxu1 %v1825_v21 }
 0x424   : > { %2264 = vmatprep.mubr.bf16.mxu1 %v1843_v61  ;;  %2601 = vmatpush1.bf16.msra.mxu1 %v3476_v30 }
 0x425   : > { %v1785_v53 = vpop.permute.xlu0 %1784 }
 0x426   : > { %v1833_v50 = vsel %vm518_vm0, %v4940_v43, %v1785_v53 }
 0x429   : > { %3302 = vmatmul.mubr.msk.bf16.vlgmr.msra.gmra.mrb[48].mxu0 %vm518_vm0, %v4937_v62  ;;  %v1787_v5 = vpop.permute.xlu0 %1786 }
 0x42a   : > { %3305 = vmatprep.mubr.msk.bf16.mxu0 %vm518_vm0, %v1750_v55  ;;  %v1837_v38 = vsel %vm518_vm0, %v4942_v24, %v1787_v5  ;;  %v3481_v55 = vld [vmem:[%s4904_s9 + $0x1c] ss:$12 sps:$4 sm:$0xff]   ;;  %3310 = vmatpush3.bf16.msra.mxu0 %v3482_v41 }
 0x42b   : > { %2265 = vmatmul.mubr.bf16.gmra.mrb[36].mxu1 %v1829_v63  ;;  %2602 = vmatprep.subr.bf16.mxu1 %v3481_v55 }
 0x42c   : > { %2272 = vmatprep.mubr.bf16.mxu1 %v1846_v44  ;;  %3311 = vmatprep.subr.bf16.mxu0 %v3486_v0 }
 0x42d   : > { %2603 = vmatpush1.bf16.msra.mxu1 %v3479_v1 }
 0x42e   : > { %2604 = vmatprep.subr.bf16.mxu1 %v3485_v16  ;;  %3312 = vmatpush3.bf16.msra.mxu0 %v3486_v0 }
 0x42f   : > { %3313 = vmatprep.subr.bf16.mxu0 %v3490_v17 }
 0x431   : > { %3306 = vmatmul.mubr.msk.bf16.gmra.mrb[52].mxu0 %vm518_vm0, %v1751_v14  ;;  %2605 = vmatpush1.bf16.msra.mxu1 %v3483_v28 }
 0x432   : > { %2606 = vmatprep.subr.bf16.mxu1 %v3489_v42  ;;  %3314 = vmatpush3.bf16.msra.mxu0 %v3490_v17 }
 0x433   : > { %2273 = vmatmul.mubr.bf16.gmra.mrb[40].mxu1 %v1833_v50  ;;  %3315 = vmatprep.subr.bf16.mxu0 %v3494_v35  ;;  %v3507_v50 = vld [vmem:[%s4904_s9 + $0xb0] ss:$12 sps:$4 sm:$0xff]  }
 0x434   : > { %2280 = vmatprep.mubr.bf16.mxu1 %v1850_v7 }
 0x435   : > { %2607 = vmatpush1.bf16.msra.mxu1 %v3487_v52 }
 0x436   : > { %2608 = vmatprep.subr.bf16.mxu1 %v3493_v10  ;;  %3316 = vmatpush3.bf16.msra.mxu0 %v3494_v35 }
 0x437   : > { %3317 = vmatprep.subr.bf16.mxu0 %v3498_v46 }
 0x439   : > { %2609 = vmatpush1.bf16.msra.mxu1 %v3491_v33 }
 0x43a   : > { %2610 = vmatprep.subr.bf16.mxu1 %v3497_v51  ;;  %3318 = vmatpush3.bf16.msra.mxu0 %v3498_v46 }
 0x43b   : > { %2281 = vmatmul.mubr.bf16.gmra.mrb[44].mxu1 %v1837_v38  ;;  %3319 = vmatprep.subr.bf16.mxu0 %v3502_v29 }
 0x43c   : > { %2632 = vmatprep.mubr.bf16.mxu1 %v4943_v37 }
 0x43d   : > { %2611 = vmatpush1.bf16.msra.mxu1 %v3495_v26 }
 0x43e   : > { %2612 = vmatprep.subr.bf16.mxu1 %v3501_v27  ;;  %3320 = vmatpush3.bf16.msra.mxu0 %v3502_v29 }
 0x43f   : > { %3321 = vmatprep.subr.bf16.mxu0 %v3506_v45 }
 0x441   : > { %2613 = vmatpush1.bf16.msra.mxu1 %v3499_v20 }
 0x442   : > { %2614 = vmatprep.subr.bf16.mxu1 %v3505_v59  ;;  %3322 = vmatpush3.bf16.msra.mxu0 %v3506_v45 }
 0x443   : > { %3323 = vmatprep.subr.bf16.mxu0 %v3507_v50 }
 0x445   : > { %2615 = vmatpush1.bf16.msra.mxu1 %v3503_v25 }
 0x446   : > { %3324 = vmatpush3.bf16.msra.mxu0 %v3507_v50  ;;  %v4944_v50 = vld [vmem:[#allocation7_spill] sm:$0xff] }
 0x4dc   : > { %v3177_v4 = vpop.f32.mrb[32].mxu0 }
 0x4dd   : > { %v3178_v57 = vpop.f32.mrb[33].mxu0 }
 0x4de   : > { %v3179_v6 = vadd.f32 %v3178_v57, %v3177_v4  ;;  %v3180_v54 = vpop.f32.mrb[34].mxu0 }
 0x4df   : > { %v3181_v36 = vpop.f32.mrb[35].mxu0 }
 0x4e0   : > { %v3182_v13 = vadd.f32 %v3181_v36, %v3180_v54  ;;  %v2194_v40 = vadd.f32 %v3179_v6, %v4717_v9 }
 0x4e2   : > { %v2197_v56 = vadd.f32 %v3182_v13, %v4717_v9 }
 0x4e4   : > { %v3183_v49 = vpop.f32.mrb[36].mxu0 }
 0x4e5   : > { %v3184_v60 = vpop.f32.mrb[37].mxu0 }
 0x4e6   : > { %v3185_v32 = vadd.f32 %v3184_v60, %v3183_v49  ;;  %v3186_v11 = vpop.f32.mrb[38].mxu0 }
 0x4e7   : > { %v3187_v47 = vpop.f32.mrb[39].mxu0 }
 0x4e8   : > { %v3188_v23 = vadd.f32 %v3187_v47, %v3186_v11  ;;  %v2202_v41 = vadd.f32 %v3185_v32, %v4717_v9 }
 0x4ea   : > { %v2205_v17 = vadd.f32 %v3188_v23, %v4717_v9 }
 0x4ec   : > { %v3189_v18 = vpop.f32.mrb[40].mxu0 }
 0x4ed   : > { %v3190_v31 = vpop.f32.mrb[41].mxu0 }
 0x4ee   : > { %v3191_v39 = vadd.f32 %v3190_v31, %v3189_v18  ;;  %v3192_v21 = vpop.f32.mrb[42].mxu0 }
 0x4ef   : > { %v3193_v12 = vpop.f32.mrb[43].mxu0 }
 0x4f0   : > { %v3194_v58 = vadd.f32 %v3193_v12, %v3192_v21  ;;  %v2210_v4 = vadd.f32 %v3191_v39, %v4717_v9 }
 0x4f2   : > { %v2213_v49 = vadd.f32 %v3194_v58, %v4717_v9 }
 0x4f4   : > { %v3195_v61 = vpop.f32.mrb[44].mxu0 }
 0x4f5   : > { %v3196_v62 = vpop.f32.mrb[45].mxu0 }
 0x4f6   : > { %v3197_v2 = vadd.f32 %v3196_v62, %v3195_v61  ;;  %v3198_v63 = vpop.f32.mrb[46].mxu0  ;;  %v3217_v48 = vpop.f32.mrb[32].mxu1 }
 0x4f7   : > { %v3199_v3 = vpop.f32.mrb[47].mxu0  ;;  %v3218_v44 = vpop.f32.mrb[33].mxu1 }
 0x4f8   : > { %v3200_v34 = vadd.f32 %v3199_v3, %v3198_v63  ;;  %v3219_v53 = vadd.f32 %v3218_v44, %v3217_v48  ;;  %v3220_v14 = vpop.f32.mrb[34].mxu1  ;;  %v2218_v12 = vadd.f32 %v3197_v2, %v4717_v9  ;;  %v2379_v2 = vpop.permute.xlu1 %2378 }
 0x4f9   : > { %v3221_v8 = vpop.f32.mrb[35].mxu1 }
 0x4fa   : > { %v3222_v15 = vadd.f32 %v3221_v8, %v3220_v14  ;;  %v2259_v43 = vadd.f32 %v3219_v53, %v2194_v40  ;;  %v2221_v3 = vadd.f32 %v3200_v34, %v4717_v9 }
 0x4fc   : > { %v3303_v7 = vpop.f32.mrb[48].mxu0  ;;  %v2262_v5 = vadd.f32 %v3222_v15, %v2197_v56  ;;  %v2381_v34 = vpop.permute.xlu1 %2380 }
 0x4fd   : > { %v2323_v22 = vpop.f32.mrb[49].mxu0 }
 0x4fe   : > { %v2324_v24 = vadd.f32 %v2323_v22, %v2259_v43  ;;  %v3223_v38 = vpop.f32.mrb[36].mxu1  ;;  %v3304_v30 = vpop.f32.mrb[50].mxu0  ;;  %v4945_v22 = vld [vmem:[#allocation8_spill] sm:$0xff] }
 0x4ff   : > { %v3224_v19 = vpop.f32.mrb[37].mxu1  ;;  %v2326_v55 = vpop.f32.mrb[51].mxu0 }
 0x500   : > { %v3225_v0 = vadd.f32 %v3224_v19, %v3223_v38  ;;  %v2327_v1 = vadd.f32 %v2326_v55, %v2262_v5  ;;  %v3226_v16 = vpop.f32.mrb[38].mxu1  ;;  %v2354_v42 = vmax.f32 %v2324_v24, 0.0  ;;  %v2404_v24 = vsel %vm2398_vm1, %v4945_v22, %v2381_v34  ;;  %v2383_v19 = vpop.permute.xlu1 %2382  ;;  %v4946_v55 = vld [vmem:[#allocation9_spill] sm:$0xff]  ;;  %v3515_v34 = vld [vmem:[%s3761_s30 + $0x58] sm:$0xff] }
 0x501   : > { %v3227_v28 = vpop.f32.mrb[39].mxu1 }
 0x502   : > { %v2267_v35 = vadd.f32 %v3225_v0, %v2202_v41  ;;  %v2355_v52 = vmax.f32 %v2327_v1, 0.0  ;;  %v3228_v10 = vadd.f32 %v3227_v28, %v3226_v16  ;;  %v2407_v41 = vsel %vm2398_vm1, %v4946_v55, %v2383_v19  ;;  %v3516_v19 = vld [vmem:[%s3761_s30 + $0x38] sm:$0xff] }
 0x504   : > { %v2332_v46 = vadd.f32 %v3303_v7, %v2267_v35  ;;  %v2370_v33 = vpack.c.bf16 %v2355_v52, %v2354_v42  ;;  %v2270_v51 = vadd.f32 %v3228_v10, %v2205_v17  ;;  %v3307_v29 = vpop.f32.mrb[52].mxu0  ;;  %v2401_v7 = vsel %vm2398_vm1, %v4944_v50, %v2379_v2  ;;  %v2385_v16 = vpop.permute.xlu1 %2384  ;;  %v4947_v17 = vld [vmem:[#allocation10_spill] sm:$0xff] }
 0x505   : > { %v2339_v26 = vpop.f32.mrb[53].mxu0  ;;  %v2410_v28 = vsel %vm2398_vm1, %v4947_v17, %v2385_v16  ;;  %v2457_v52 = vlaneseq }
 0x506   : > { %v2335_v27 = vadd.f32 %v3304_v30, %v2270_v51  ;;  %v3308_v45 = vpop.f32.mrb[54].mxu0  ;;  %2390 = vrot.lane.b32.xlu0 %v2370_v33, %s4924_s12  ;;  %v3229_v20 = vpop.f32.mrb[40].mxu1  ;;  %v2356_v57 = vmax.f32 %v2332_v46, 0.0  ;;  %v2455_v33 = vld [vmem:[%s4905_s10] sm:$0x7] }
 0x507   : > { %v3230_v59 = vpop.f32.mrb[41].mxu1  ;;  %v2342_v25 = vpop.f32.mrb[55].mxu0  ;;  %v2458_v10 = vshrl.u32 %v2457_v52, 7 }
 0x508   : > { %v2357_v6 = vmax.f32 %v2335_v27, 0.0  ;;  %v3231_v54 = vadd.f32 %v3230_v59, %v3229_v20  ;;  %v3232_v36 = vpop.f32.mrb[42].mxu1 }
 0x509   : > { %v3233_v13 = vpop.f32.mrb[43].mxu1  ;;  %v2459_v46 = vsub.s32 0, %v2458_v10  ;;  %v2463_v51 = vsub.s32 1, %v2458_v10 }
 0x50a   : > { %v2275_v60 = vadd.f32 %v3231_v54, %v2210_v4  ;;  %v3234_v32 = vadd.f32 %v3233_v13, %v3232_v36  ;;  %v2371_v11 = vpack.c.bf16 %v2357_v6, %v2356_v57  ;;  %v3508_v4 = vld [vmem:[%s3761_s30] sm:$0xff]  ;;  %v3509_v13 = vld [vmem:[%s3761_s30 + $0x8] sm:$0xff] }
 0x50c   : > { %v2340_v47 = vadd.f32 %v2339_v26, %v2275_v60  ;;  %v2278_v23 = vadd.f32 %v3234_v32, %v2213_v49  ;;  %2392 = vrot.lane.b32.xlu0 %v2371_v11, %s4924_s12  ;;  %v2467_v26 = vsub.s32 2, %v2458_v10  ;;  %v3510_v11 = vld [vmem:[%s3761_s30 + $0x18] sm:$0xff]  ;;  %v3519_v10 = vld [vmem:[%s3761_s30 + $0x50] sm:$0xff] }
 0x50e   : > { %v2343_v18 = vadd.f32 %v2342_v25, %v2278_v23  ;;  %v3235_v31 = vpop.f32.mrb[44].mxu1  ;;  %v2358_v39 = vmax.f32 %v2340_v47, 0.0  ;;  %v4763_v36 = vrot.slane %v2455_v33, %v2467_v26 }
 0x50f   : > { %v3236_v21 = vpop.f32.mrb[45].mxu1 }
 0x510   : > { %v2359_v61 = vmax.f32 %v2343_v18, 0.0  ;;  %v3237_v62 = vadd.f32 %v3236_v21, %v3235_v31  ;;  %v3238_v63 = vpop.f32.mrb[46].mxu1  ;;  %v3511_v18 = vld [vmem:[%s3761_s30 + $0x20] sm:$0xff] }
 0x511   : > { %v3239_v48 = vpop.f32.mrb[47].mxu1 }
 0x512   : > { %v2283_v58 = vadd.f32 %v3237_v62, %v2218_v12  ;;  %v3240_v44 = vadd.f32 %v3239_v48, %v3238_v63  ;;  %v2372_v40 = vpack.c.bf16 %v2359_v61, %v2358_v39 }
 0x514   : > { %v2348_v53 = vadd.f32 %v3307_v29, %v2283_v58  ;;  %v2286_v14 = vadd.f32 %v3240_v44, %v2221_v3  ;;  %2394 = vrot.lane.b32.xlu0 %v2372_v40, %s4924_s12  ;;  %v4755_v29 = vrot.slane %v2455_v33, %v2463_v51  ;;  %v3512_v58 = vld [vmem:[%s3761_s30 + $0x40] sm:$0xff] }
 0x516   : > { %v2351_v8 = vadd.f32 %v3308_v45, %v2286_v14  ;;  %v2360_v56 = vmax.f32 %v2348_v53, 0.0 }
 0x518   : > { %v2361_v15 = vmax.f32 %v2351_v8, 0.0 }
 0x51a   : > { %v2373_v43 = vpack.c.bf16 %v2361_v15, %v2360_v56  ;;  %v3513_v56 = vld [vmem:[%s3761_s30 + $0x10] sm:$0xff] }
 0x51c   : > { %2396 = vrot.lane.b32.xlu0 %v2373_v43, %s4924_s12  ;;  %s3536_s12 = sshll.u32 %s3601_s24, 4  ;;  %s3537_s12 = int_to_ptr.vmem [resolvable:$false] %s3536_s12 }
 0x51d   : > { %s3538_s25 = scalar_lea.vmem %s3537_s12, 6144  ;;  %p3539_p0 = scmp.lt.s32.totalorder %s4840_s0, %s3537_s12 }
 0x51e   : > { %p3540_p1 = scmp.lt.s32.totalorder %s3538_s25, %s3532_s26 }
 0x520   : > { %p3541_p2 = por %p3540_p1, %p3539_p0 }
 0x522   : > { %p3542_p3 = pnand %p3541_p2, %p3535_p13 }
 0x578   : > { %v2391_v5 = vpop.permute.xlu0 %2390 }
 0x579   : > { %v2412_v9 = vsel %vm518_vm0, %v2401_v7, %v2391_v5  ;;  %v3514_v5 = vld [vmem:[%s3761_s30 + $0x30] sm:$0xff] }
 0x57a   : > { %2633 = vmatmul.mubr.bf16.vlgmr.msra.gmra.mrb[48].mxu1 %v2412_v9  ;;  %3325 = vmatprep.mubr.bf16.mxu0 %v2412_v9 }
 0x57b   : > { %2642 = vmatprep.mubr.bf16.mxu1 %v4943_v37 }
 0x57e   : > { %v2393_v38 = vpop.permute.xlu0 %2392 }
 0x57f   : > { %v2415_v30 = vsel %vm518_vm0, %v2404_v24, %v2393_v38 }
 0x580   : > { %3326 = vmatmul.mubr.bf16.vlgmr.msra.gmra.mrb[56].mxu0 %v2415_v30 }
 0x582   : > { %2643 = vmatmul.mubr.bf16.gmra.mrb[52].mxu1 %v2415_v30 }
 0x583   : > { %2652 = vmatprep.mubr.bf16.mxu1 %v4943_v37 }
 0x586   : > { %v2395_v0 = vpop.permute.xlu0 %2394 }
 0x587   : > { %v2418_v1 = vsel %vm518_vm0, %v2407_v41, %v2395_v0  ;;  %v3517_v41 = vld [vmem:[%s3761_s30 + $0x28] sm:$0xff] }
 0x588   : > { %3329 = vmatprep.mubr.bf16.mxu0 %v2418_v1 }
 0x58a   : > { %2653 = vmatmul.mubr.bf16.gmra.mrb[56].mxu1 %v2418_v1 }
 0x58b   : > { %2662 = vmatprep.mubr.bf16.mxu1 %v4943_v37  ;;  %v4753_v37 = vrot.slane %v2455_v33, %v2459_v46 }
 0x58e   : > { %v2397_v42 = vpop.permute.xlu0 %2396 }
 0x58f   : > { %v2421_v35 = vsel %vm518_vm0, %v2410_v28, %v2397_v42  ;;  %v3518_v28 = vld [vmem:[%s3761_s30 + $0x48] sm:$0xff] }
 0x590   : > { %3330 = vmatmul.mubr.bf16.gmra.mrb[60].mxu0 %v2421_v35 }
 0x592   : > { %2663 = vmatmul.mubr.bf16.gmra.mrb[60].mxu1 %v2421_v35 }
 0x64d   : > { %v2634_v27 = vpop.f32.mrb[48].mxu1 }
 0x64e   : > { %v2635_v45 = vadd.f32 %v2634_v27, %v4753_v37  ;;  %v2636_v20 = vpop.f32.mrb[49].mxu1 }
 0x64f   : > { %v2637_v59 = vadd.f32 %v2636_v20, %v4755_v29  ;;  %v2638_v25 = vpop.f32.mrb[50].mxu1 }
 0x650   : > { %v2738_v57 = vadd.f32 %v3508_v4, %v2635_v45  ;;  %v2639_v6 = vadd.f32 %v2638_v25, %v4753_v37  ;;  %v2640_v54 = vpop.f32.mrb[51].mxu1  ;;  %v3520_v25 = vld [vmem:[%s3761_s30 + $0x60] sm:$0xff] }
 0x651   : > { %v2739_v49 = vadd.f32 %v3509_v13, %v2637_v59  ;;  %v2641_v60 = vadd.f32 %v2640_v54, %v4755_v29  ;;  %v3521_v54 = vld [vmem:[%s3761_s30 + $0x68] sm:$0xff] }
 0x652   : > { %v2762_v32 = vmax.f32 %v2738_v57, 0.0  ;;  %v2741_v47 = vadd.f32 %v3510_v11, %v2639_v6 }
 0x653   : > { %v2763_v23 = vmax.f32 %v2739_v49, 0.0  ;;  %v2742_v31 = vadd.f32 %v3511_v18, %v2641_v60  ;;  %v3327_v21 = vpop.f32.mrb[56].mxu0 }
 0x654   : > { %2786 = vst [vmem:[%s4769_s16] sm:$0xff] %v2762_v32  ;;  %v2765_v12 = vmax.f32 %v2741_v47, 0.0  ;;  %v2716_v39 = vadd.f32 %v3327_v21, %v4763_v36  ;;  %v2707_v61 = vpop.f32.mrb[57].mxu0  ;;  %v3522_v32 = vld [vmem:[%s3761_s30 + $0x78] sm:$0xff] }
 0x655   : > { %2787 = vst [vmem:[%s4769_s16 + $0x8] sm:$0xff] %v2763_v23  ;;  %v2766_v62 = vmax.f32 %v2742_v31, 0.0  ;;  %v2708_v63 = vadd.f32 %v2707_v61, %v4763_v36  ;;  %v2644_v48 = vpop.f32.mrb[52].mxu1  ;;  %v3328_v3 = vpop.f32.mrb[58].mxu0  ;;  %v3523_v23 = vld [vmem:[%s3761_s30 + $0x80] sm:$0xff] }
 0x656   : > { %2789 = vst [vmem:[%s4769_s16 + $0x18] sm:$0xff] %v2765_v12  ;;  %v2746_v44 = vadd.f32 %v3512_v58, %v2716_v39  ;;  %v2645_v40 = vadd.f32 %v2644_v48, %v4753_v37  ;;  %v2719_v53 = vadd.f32 %v3328_v3, %v4763_v36  ;;  %v2646_v14 = vpop.f32.mrb[53].mxu1  ;;  %v2710_v8 = vpop.f32.mrb[59].mxu0  ;;  %v3524_v3 = vld [vmem:[%s3761_s30 + $0xa0] sm:$0xff] }
 0x657   : > { %2790 = vst [vmem:[%s4769_s16 + $0x20] sm:$0xff] %v2766_v62  ;;  %v2740_v15 = vadd.f32 %v3513_v56, %v2708_v63  ;;  %v2647_v43 = vadd.f32 %v2646_v14, %v4755_v29  ;;  %v2711_v2 = vadd.f32 %v2710_v8, %v4763_v36  ;;  %v2648_v50 = vpop.f32.mrb[54].mxu1  ;;  %v3525_v8 = vld [vmem:[%s3761_s30 + $0x70] sm:$0xff] }
 0x658   : > { %v2770_v7 = vmax.f32 %v2746_v44, 0.0  ;;  %v2744_v9 = vadd.f32 %v3514_v5, %v2645_v40  ;;  %v2749_v22 = vadd.f32 %v3515_v34, %v2719_v53  ;;  %v2649_v24 = vadd.f32 %v2648_v50, %v4753_v37  ;;  %v2650_v38 = vpop.f32.mrb[55].mxu1 }
 0x659   : > { %v2764_v30 = vmax.f32 %v2740_v15, 0.0  ;;  %v2745_v55 = vadd.f32 %v3516_v19, %v2647_v43  ;;  %v2743_v0 = vadd.f32 %v3517_v41, %v2711_v2  ;;  %v2651_v1 = vadd.f32 %v2650_v38, %v4755_v29 }
 0x65a   : > { %2794 = vst.msk [vmem:[%s4769_s16 + $0x40] sm:$0xff] %vm518_vm0, %v2770_v7  ;;  %v2768_v16 = vmax.f32 %v2744_v9, 0.0  ;;  %v2773_v17 = vmax.f32 %v2749_v22, 0.0  ;;  %v2747_v42 = vadd.f32 %v3518_v28, %v2649_v24  ;;  %v3526_v7 = vld [vmem:[%s3761_s30 + $0x90] sm:$0xff]  ;;  %v3527_v9 = vld [vmem:[%s3761_s30 + $0xb8] sm:$0xff] }
 0x65b   : > { %2788 = vst.msk [vmem:[%s4769_s16 + $0x10] sm:$0xff] %vm518_vm0, %v2764_v30  ;;  %v2769_v35 = vmax.f32 %v2745_v55, 0.0  ;;  %v2767_v52 = vmax.f32 %v2743_v0, 0.0  ;;  %v2748_v46 = vadd.f32 %v3519_v10, %v2651_v1  ;;  %v3528_v30 = vld [vmem:[%s3761_s30 + $0x98] sm:$0xff]  ;;  %v3529_v55 = vld [vmem:[%s3761_s30 + $0x88] sm:$0xff] }
 0x65c   : > { %2792 = vst [vmem:[%s4769_s16 + $0x30] sm:$0xff] %v2768_v16  ;;  %2797 = vst.msk [vmem:[%s4769_s16 + $0x58] sm:$0xff] %vm518_vm0, %v2773_v17  ;;  %v2771_v33 = vmax.f32 %v2747_v42, 0.0  ;;  %v3531_v42 = vld [vmem:[%s3761_s30 + $0xb0] sm:$0xff] }
 0x65d   : > { %2793 = vst [vmem:[%s4769_s16 + $0x38] sm:$0xff] %v2769_v35  ;;  %2791 = vst.msk [vmem:[%s4769_s16 + $0x28] sm:$0xff] %vm518_vm0, %v2767_v52  ;;  %v2772_v51 = vmax.f32 %v2748_v46, 0.0  ;;  %v2654_v26 = vpop.f32.mrb[56].mxu1 }
 0x65e   : > { %2795 = vst [vmem:[%s4769_s16 + $0x48] sm:$0xff] %v2771_v33  ;;  %v2655_v27 = vadd.f32 %v2654_v26, %v4753_v37  ;;  %v2656_v45 = vpop.f32.mrb[57].mxu1 }
 0x65f   : > { %2796 = vst [vmem:[%s4769_s16 + $0x50] sm:$0xff] %v2772_v51  ;;  %v2657_v20 = vadd.f32 %v2656_v45, %v4755_v29  ;;  %v2658_v59 = vpop.f32.mrb[58].mxu1 }
 0x660   : > { %v2750_v4 = vadd.f32 %v3520_v25, %v2655_v27  ;;  %v2659_v57 = vadd.f32 %v2658_v59, %v4753_v37  ;;  %v2660_v6 = vpop.f32.mrb[59].mxu1 }
 0x661   : > { %v2751_v13 = vadd.f32 %v3521_v54, %v2657_v20  ;;  %v2661_v49 = vadd.f32 %v2660_v6, %v4755_v29 }
 0x662   : > { %v2774_v60 = vmax.f32 %v2750_v4, 0.0  ;;  %v2753_v11 = vadd.f32 %v3522_v32, %v2659_v57 }
 0x663   : > { %v2775_v47 = vmax.f32 %v2751_v13, 0.0  ;;  %v2754_v18 = vadd.f32 %v3523_v23, %v2661_v49  ;;  %v3331_v31 = vpop.f32.mrb[60].mxu0 }
 0x664   : > { %2798 = vst [vmem:[%s4769_s16 + $0x60] sm:$0xff] %v2774_v60  ;;  %v2777_v21 = vmax.f32 %v2753_v11, 0.0  ;;  %v2732_v12 = vadd.f32 %v3331_v31, %v4763_v36  ;;  %v2723_v39 = vpop.f32.mrb[61].mxu0 }
 0x665   : > { %2799 = vst [vmem:[%s4769_s16 + $0x68] sm:$0xff] %v2775_v47  ;;  %v2778_v61 = vmax.f32 %v2754_v18, 0.0  ;;  %v2724_v62 = vadd.f32 %v2723_v39, %v4763_v36  ;;  %v2664_v63 = vpop.f32.mrb[60].mxu1  ;;  %v3332_v48 = vpop.f32.mrb[62].mxu0 }
 0x666   : > { %2801 = vst [vmem:[%s4769_s16 + $0x78] sm:$0xff] %v2777_v21  ;;  %v2758_v58 = vadd.f32 %v3524_v3, %v2732_v12  ;;  %v2665_v44 = vadd.f32 %v2664_v63, %v4753_v37  ;;  %v2735_v40 = vadd.f32 %v3332_v48, %v4763_v36  ;;  %v2666_v53 = vpop.f32.mrb[61].mxu1  ;;  %v2726_v14 = vpop.f32.mrb[63].mxu0 }
 0x667   : > { %2802 = vst [vmem:[%s4769_s16 + $0x80] sm:$0xff] %v2778_v61  ;;  %v2752_v56 = vadd.f32 %v3525_v8, %v2724_v62  ;;  %v2667_v15 = vadd.f32 %v2666_v53, %v4755_v29  ;;  %v2727_v43 = vadd.f32 %v2726_v14, %v4763_v36  ;;  %v2668_v2 = vpop.f32.mrb[62].mxu1 }
 0x668   : > { %v2782_v50 = vmax.f32 %v2758_v58, 0.0  ;;  %v2756_v5 = vadd.f32 %v3526_v7, %v2665_v44  ;;  %v2761_v34 = vadd.f32 %v3527_v9, %v2735_v40  ;;  %v2669_v22 = vadd.f32 %v2668_v2, %v4753_v37  ;;  %v2670_v24 = vpop.f32.mrb[63].mxu1  ;;  %v3530_v37 = vld [vmem:[%s3761_s30 + $0xa8] sm:$0xff]  ;;  %s4854_s30 = scalar_lea.sflag [#allocation4], %s377_s13 }
 0x669   : > { %v2776_v38 = vmax.f32 %v2752_v56, 0.0  ;;  %v2757_v19 = vadd.f32 %v3528_v30, %v2667_v15  ;;  %v2755_v36 = vadd.f32 %v3529_v55, %v2727_v43  ;;  %v2671_v41 = vadd.f32 %v2670_v24, %v4755_v29 }
 0x66a   : > { %2806 = vst.msk [vmem:[%s4769_s16 + $0xa0] sm:$0xff] %vm518_vm0, %v2782_v50  ;;  %v2780_v0 = vmax.f32 %v2756_v5, 0.0  ;;  %v2785_v1 = vmax.f32 %v2761_v34, 0.0  ;;  %v2759_v16 = vadd.f32 %v3530_v37, %v2669_v22 }
 0x66b   : > { %2800 = vst.msk [vmem:[%s4769_s16 + $0x70] sm:$0xff] %vm518_vm0, %v2776_v38  ;;  %v2781_v17 = vmax.f32 %v2757_v19, 0.0  ;;  %v2779_v28 = vmax.f32 %v2755_v36, 0.0  ;;  %v2760_v29 = vadd.f32 %v3531_v42, %v2671_v41 }
 0x66c   : > { %2804 = vst [vmem:[%s4769_s16 + $0x90] sm:$0xff] %v2780_v0  ;;  %2809 = vst.msk [vmem:[%s4769_s16 + $0xb8] sm:$0xff] %vm518_vm0, %v2785_v1  ;;  %v2783_v35 = vmax.f32 %v2759_v16, 0.0 }
 0x66d   : > { %2805 = vst [vmem:[%s4769_s16 + $0x98] sm:$0xff] %v2781_v17  ;;  %2803 = vst.msk [vmem:[%s4769_s16 + $0x88] sm:$0xff] %vm518_vm0, %v2779_v28  ;;  %v2784_v52 = vmax.f32 %v2760_v29, 0.0 }
 0x66e   : > { %2807 = vst [vmem:[%s4769_s16 + $0xa8] sm:$0xff] %v2783_v35 }
 0x66f   : > { %2808 = vst [vmem:[%s4769_s16 + $0xb0] sm:$0xff] %v2784_v52 }
 0x670   : > { %3545 = shalt.err (!%p3542_p3)
}
 0x671   : > { %s3546_s13 = scalar_lea.hbm %s4848_s14, 3072  ;;  %s3550_s29 = scalar_lea.hbm %s4906_s11, 6144 }
 0x672   : > { %p3547_p4 = scmp.ne.s32.totalorder %s4848_s14, %s3546_s13  ;;  %p3551_p9 = scmp.lt.u32.totalorder %s4848_s14, %s4906_s11 }
 0x673   : > { %p3552_p10 = scmp.lt.u32.totalorder %s3550_s29, %s3546_s13  ;;  %p3554_p12 = scmp.lt.u32.totalorder %s3546_s13, %s4848_s14 }
 0x674   : > { %p3548_p7 = pnand %p3547_p4, %p3702_p5 }
 0x675   : > { %p3553_p11 = por %p3552_p10, %p3551_p9 }
 0x676   : > { %p3549_p8 = pneg %p3548_p7 }
 0x677   : > { %p3555_p13 = por %p3554_p12, %p3553_p11 }
 0x679   : > { %p3556_p0 = pnand %p3555_p13, %p3549_p8 }
 0x67b   : > { %3559 = shalt.err (!%p3556_p0)
}
 0x67c   : > { %s3602_s26 = smov 384   ;;  %s3603_s24 = smov 24  }
 0x67d   : > { %3336 = dma.vmem_to_hbm [thread:$0]  (%p3702_p5), %s4840_s0, 3072, %s4848_s14, %s4854_s30, %s3602_s26, %s3602_s26, %s3603_s24  }
 0x67e PF: > { %p3342_p1 = scmp.ge.s32.totalorder %s3594_s20, 2  ;;  %s2839_s12 = sand.u32 1, %s3582_s17  }
 0x67f   : > { %s2840_s25 = scalar_lea.sflag [#allocation4], %s2839_s12 }
 0x680   : > { %p3339_p2 = pnand %p3342_p1, %p3706_p6 }
 0x682   : > { %3577 = dma.done.wait (!%p3339_p2), %s2840_s25, 3072  }
 0x683   : > { %3579 = vsyncadd (!%p3339_p2), %s2840_s25, 4294964224  ;;  %s4948_s13 = sld [smem:[#allocation6_spill]]  ;;  %p21_p3 = scmp.ge.s32.totalorder %s3689_s23, 4  }
 0x684   : > { %s4949_s17 = smov %s3586_s18  ;;  %s4950_s18 = smov %s3590_s19 }
 0x685   : > { %s4952_s20 = smov %s3689_s23  ;;  %23 = sbr.rel (!%p21_p3) target bundleno = 5 (0x5), region = 99 }
 0x689   : > { %s4951_s19 = smov %s4948_s13 }
 0x68c   :  { %2845 = vsyncpa [#allocation4], 1 }
 0x68d   :  { %2847 = vsyncpa [#allocation4 + $0x1], 1 }

</bundles_post_ra>
